<compile_context>
chip_gen: v7x
topology: tpu7x:2x2x1
jax: 0.10.0
libtpu: 0.0.40
codegen_flags: <defaults>
</compile_context>

<pallas_src>
import functools

import jax
import jax.numpy as jnp
from jax.experimental import pallas as pl
from jax.experimental.pallas import tpu as pltpu

# Hyper-parameters from the module's __init__ (args.num_positive /
# args.num_negative, m = 0, y = 10). Deterministic, set in-script.
NUM_POSITIVE = 6
NUM_NEGATIVE = 8
M_CONST = 0.0
Y_CONST = 10.0

_NUM_PARTIALS = 2          # v7x has 2 TensorCores; harmless (outer loop) on v5e/v6e.
_DEFAULT_TILE_ROWS = 4096  # (4096, 128) f32 block = 2 MiB -> 4 MiB double-buffered.
_MIN_KERNEL_BATCH = 16384  # below this the fused pure-JAX path wins (fixed costs).


def _ceil_log2(n):
    return max(0, (int(n) - 1).bit_length())


def _mcce_jax(y_pred, num_positive, num_negative, m_const, y_const):
    """Pure-JAX forward mirroring the PyTorch module (also the small-B path)."""
    x = y_pred.astype(jnp.float32)
    x_pos = -y_const * x[:, :num_positive]
    x_neg = y_const * (x[:, num_positive:num_positive + num_negative] + m_const)
    z = (jax.scipy.special.logsumexp(x_neg, axis=1)
         + jax.scipy.special.logsumexp(x_pos, axis=1))
    return jnp.sum(jax.nn.softplus(z)) / y_pred.shape[0]


def _mcce_kernel(x_ref, o_ref, *, num_positive, num_negative, seg, y_const,
                 m_const, total_rows, tile_rows, tiles_per_part, needs_row_mask):
    p = pl.program_id(0)          # partial / core index ("parallel")
    i = pl.program_id(1)          # tile index within this partial ("arbitrary")

    @pl.when(i == 0)
    def _():
        o_ref[...] = jnp.zeros_like(o_ref)

    x = x_ref[...].astype(jnp.float32)             # (TR, 128), lane-dense
    neg_inf = jnp.float32(-jnp.inf)

    lane = jax.lax.broadcasted_iota(jnp.int32, (1, 128), 1)
    cpos = lane % seg                               # class index within segment
    pos_mask = cpos < num_positive
    neg_mask = jnp.logical_and(cpos >= num_positive,
                               cpos < num_positive + num_negative)
    start_mask = cpos == 0

    # Scaled class scores; dead lanes -> -inf so they vanish in max/exp/sum.
    xp = jnp.where(pos_mask, x * jnp.float32(-y_const), neg_inf)
    xn_val = x * jnp.float32(y_const)
    if m_const != 0.0:
        xn_val = xn_val + jnp.float32(y_const * m_const)
    xn = jnp.where(neg_mask, xn_val, neg_inf)

    def seg_cyclic_max(v):
        # After log2(seg) steps every lane holds the max over its own segment.
        for s in range(seg.bit_length() - 1):
            k = 1 << s
            fwd = pltpu.roll(v, (-k) % 128, axis=1)     # lane i <- lane i+k
            wrap = pltpu.roll(v, seg - k, axis=1)       # lane i <- lane i+k-seg
            v = jnp.maximum(v, jnp.where(cpos < seg - k, fwd, wrap))
        return v

    def seg_window_sum(v, span):
        # Forward window sum; exact at segment-start lanes because the nonzero
        # span fits inside [0, 2^ceil(log2(span))) <= seg.
        for s in range(_ceil_log2(span)):
            k = 1 << s
            v = v + pltpu.roll(v, (-k) % 128, axis=1)
        return v

    mp = seg_cyclic_max(xp)                         # per-segment positive max
    mn = seg_cyclic_max(xn)                         # per-segment negative max

    # Single EUP exp pass covering both branches (dead lanes: exp(-inf) = 0).
    e = jnp.exp(jnp.maximum(xp - mp, xn - mn))
    ep = jnp.where(pos_mask, e, 0.0)
    en = e - ep

    s_pos = seg_window_sum(ep, num_positive)
    s_neg = seg_window_sum(en, num_positive + num_negative)

    # z = logsumexp(neg) + logsumexp(pos), valid at segment-start lanes.
    z = (mp + mn) + jnp.log(s_pos * s_neg)
    sp = jnp.maximum(z, 0.0) + jnp.log1p(jnp.exp(-jnp.abs(z)))   # stable softplus

    if needs_row_mask:
        g = p * tiles_per_part + i                  # un-clamped global tile idx
        remaining = total_rows - g * tile_rows      # <= 0 for duplicated tiles
        row = jax.lax.broadcasted_iota(jnp.int32, (tile_rows, 1), 0)
        valid = jnp.logical_and(start_mask, row < remaining)
    else:
        valid = start_mask
    contrib = jnp.where(valid, sp, 0.0)

    # Wide (8, 128) accumulator: pure VPU adds, no cross-lane reduce in-kernel.
    part = jnp.sum(contrib.reshape(tile_rows // 8, 8, 128), axis=0)
    o_ref[...] += part.reshape(1, 8, 128)


def multilabel_categorical_crossentropy(y_pred,
                                        num_positive=NUM_POSITIVE,
                                        num_negative=NUM_NEGATIVE,
                                        m_const=M_CONST,
                                        y_const=Y_CONST,
                                        *,
                                        tile_rows=_DEFAULT_TILE_ROWS,
                                        min_kernel_batch=_MIN_KERNEL_BATCH):
    batch, n_cols = y_pred.shape
    n_cls = num_positive + num_negative
    if n_cls > n_cols:
        raise ValueError("y_pred has fewer columns than num_positive+num_negative")

    elems_per_row = 128 // n_cols if (n_cols > 0 and 128 % n_cols == 0) else 0
    kernel_ok = (elems_per_row > 0
                 and num_positive > 0 and num_negative > 0
                 and batch % (8 * elems_per_row) == 0
                 and batch >= min_kernel_batch)
    if not kernel_ok:
        # Small batches / incompatible shapes: XLA fuses this into one pass.
        return _mcce_jax(y_pred, num_positive, num_negative, m_const, y_const)

    rows = (batch * n_cols) // 128
    # Metadata-only reshape: (B, C) row-major == (B*C/128, 128). No HBM copy,
    # no transpose pass; the kernel streams the input exactly once.
    x2d = y_pred.reshape(rows, 128)

    tr = max(8, (min(int(tile_rows), rows) // 8) * 8)
    n_tiles = -(-rows // tr)
    tpp = -(-n_tiles // _NUM_PARTIALS)              # tiles per partial / core
    needs_row_mask = (rows % tr != 0) or (n_tiles % _NUM_PARTIALS != 0)

    kernel = functools.partial(
        _mcce_kernel,
        num_positive=num_positive, num_negative=num_negative, seg=n_cols,
        y_const=float(y_const), m_const=float(m_const),
        total_rows=rows, tile_rows=tr, tiles_per_part=tpp,
        needs_row_mask=needs_row_mask)

    def in_map(p, i):
        # Clamp so duplicated tiles (when n_tiles % NUM_PARTIALS != 0) never
        # DMA out of bounds; their contribution is masked to zero in-kernel.
        return (jnp.minimum(p * tpp + i, n_tiles - 1), 0)

    partials = pl.pallas_call(
        kernel,
        out_shape=jax.ShapeDtypeStruct((_NUM_PARTIALS, 8, 128), jnp.float32),
        grid=(_NUM_PARTIALS, tpp),
        in_specs=[pl.BlockSpec((tr, 128), in_map)],
        out_specs=pl.BlockSpec((1, 8, 128), lambda p, i: (p, 0, 0)),
        # Default scoped-VMEM limits are ample for the ~4 MiB double-buffered
        # tile on v5e/v6e/v7x, so no vmem_limit_bytes override is needed.
        compiler_params=pltpu.CompilerParams(
            dimension_semantics=("parallel", "arbitrary")),
    )(x2d)
    return jnp.sum(partials) / batch


if __name__ == "__main__":
    # 1) Small, module-sized shape (batch=8, classes=16) -> small-batch path.
    key = jax.random.PRNGKey(0)
    y_small = jax.random.normal(key, (8, 16), dtype=jnp.float32)
    loss_small = jax.block_until_ready(
        multilabel_categorical_crossentropy(y_small))
    ref_small = _mcce_jax(y_small, NUM_POSITIVE, NUM_NEGATIVE, M_CONST, Y_CONST)
    assert jnp.allclose(loss_small, ref_small, rtol=1e-5, atol=1e-5), (
        loss_small, ref_small)

    # 2) Kernel path, forced: multi-tile, both partials, a partial last tile
    #    and one clamped duplicate tile (rows=256, tile=56 -> 5 real tiles).
    y2 = 2.0 * jax.random.normal(jax.random.PRNGKey(1), (2048, 16), jnp.float32)
    loss2 = jax.block_until_ready(
        multilabel_categorical_crossentropy(y2, tile_rows=56, min_kernel_batch=0))
    ref2 = _mcce_jax(y2, NUM_POSITIVE, NUM_NEGATIVE, M_CONST, Y_CONST)
    assert jnp.allclose(loss2, ref2, rtol=1e-4, atol=1e-4), (loss2, ref2)

    # 3) Kernel path with bf16 streaming (storage-only; f32 compute in-kernel)
    #    and the default tile size (single tile per partial + one duplicate).
    y3 = y2.astype(jnp.bfloat16)
    loss3 = jax.block_until_ready(
        multilabel_categorical_crossentropy(y3, min_kernel_batch=0))
    ref3 = _mcce_jax(y3, NUM_POSITIVE, NUM_NEGATIVE, M_CONST, Y_CONST)
    assert jnp.allclose(loss3, ref3, rtol=1e-4, atol=1e-4), (loss3, ref3)

    print("KERNEL_OK")
</pallas_src>

<mosaic_0001>
module attributes {stable_mosaic.version = 11 : i64} {
  func.func @_mcce_kernel(%arg0: i32, %arg1: i32, %arg2: memref<56x128xf32, #tpu.memory_space<vmem>>, %arg3: memref<1x8x128xf32, #tpu.memory_space<vmem>>) attributes {dimension_semantics = [#tpu.dimension_semantics<parallel>, #tpu.dimension_semantics<arbitrary>], iteration_bounds = array<i64: 2, 3>, scalar_prefetch = 0 : i64, scratch_operands = 0 : i64, tpu.core_type = #tpu.core_type<tc>, window_params = [{transform_indices = @transform_0, window_bounds = array<i64: 56, 128>}, {transform_indices = @transform_1, window_bounds = array<i64: 1, 8, 128>}]} {
    %c0_i32 = arith.constant 0 : i32
    %0 = arith.cmpi eq, %arg1, %c0_i32 : i32
    %1 = arith.extui %0 : i1 to i32
    %c0_i32_0 = arith.constant 0 : i32
    %2 = arith.cmpi ne, %1, %c0_i32_0 : i32
    scf.if %2 {
      %cst_46 = arith.constant 0.000000e+00 : f32
      %159 = vector.broadcast %cst_46 : f32 to vector<1x8x128xf32>
      %c0_47 = arith.constant 0 : index
      %c0_48 = arith.constant 0 : index
      %c0_49 = arith.constant 0 : index
      %160 = vector.load %arg3[%c0_47, %c0_48, %c0_49] : memref<1x8x128xf32, #tpu.memory_space<vmem>>, vector<1x8x128xf32>
      tpu.vector_store %arg3[%c0_47, %c0_48, %c0_49], %159 {strides = array<i32>} : memref<1x8x128xf32, #tpu.memory_space<vmem>>, vector<1x8x128xf32>,
    } else {
    }
    %c0 = arith.constant 0 : index
    %c0_1 = arith.constant 0 : index
    %3 = vector.load %arg2[%c0, %c0_1] : memref<56x128xf32, #tpu.memory_space<vmem>>, vector<56x128xf32>
    %4 = tpu.iota {dimensions = array<i32: 1>} : vector<1x128xi32>
    %c16_i32 = arith.constant 16 : i32
    %c0_i32_2 = arith.constant 0 : i32
    %5 = arith.cmpi eq, %c16_i32, %c0_i32_2 : i32
    %c1_i32 = arith.constant 1 : i32
    %6 = arith.select %5, %c1_i32, %c16_i32 : i32
    %7 = vector.broadcast %6 : i32 to vector<1x128xi32>
    %8 = arith.remsi %4, %7 : vector<1x128xi32>
    %c0_i32_3 = arith.constant 0 : i32
    %9 = vector.broadcast %c0_i32_3 : i32 to vector<1x128xi32>
    %10 = arith.cmpi ne, %8, %9 : vector<1x128xi32>
    %c0_i32_4 = arith.constant 0 : i32
    %11 = vector.broadcast %c0_i32_4 : i32 to vector<1x128xi32>
    %12 = arith.cmpi slt, %8, %11 : vector<1x128xi32>
    %c0_i32_5 = arith.constant 0 : i32
    %13 = arith.cmpi slt, %6, %c0_i32_5 : i32
    %14 = vector.broadcast %13 : i1 to vector<1x128xi1>
    %15 = vector.broadcast %14 : vector<1x128xi1> to vector<1x128xi1>
    %16 = arith.xori %12, %15 : vector<1x128xi1>
    %17 = arith.andi %16, %10 : vector<1x128xi1>
    %18 = vector.broadcast %6 : i32 to vector<1x128xi32>
    %19 = arith.addi %8, %18 : vector<1x128xi32>
    %20 = arith.select %17, %19, %8 : vector<1x128xi1>, vector<1x128xi32>
    %c6_i32 = arith.constant 6 : i32
    %21 = vector.broadcast %c6_i32 : i32 to vector<1x128xi32>
    %22 = arith.cmpi slt, %20, %21 : vector<1x128xi32>
    %c6_i32_6 = arith.constant 6 : i32
    %23 = vector.broadcast %c6_i32_6 : i32 to vector<1x128xi32>
    %24 = arith.cmpi sge, %20, %23 : vector<1x128xi32>
    %c14_i32 = arith.constant 14 : i32
    %25 = vector.broadcast %c14_i32 : i32 to vector<1x128xi32>
    %26 = arith.cmpi slt, %20, %25 : vector<1x128xi32>
    %27 = arith.andi %24, %26 : vector<1x128xi1>
    %c0_i32_7 = arith.constant 0 : i32
    %28 = vector.broadcast %c0_i32_7 : i32 to vector<1x128xi32>
    %29 = arith.cmpi eq, %20, %28 : vector<1x128xi32>
    %cst = arith.constant -1.000000e+01 : f32
    %30 = vector.broadcast %cst : f32 to vector<56x128xf32>
    %31 = arith.mulf %3, %30 : vector<56x128xf32>
    %cst_8 = arith.constant 0xFF800000 : f32
    %32 = vector.shape_cast %22 : vector<1x128xi1> to vector<1x128xi1>
    %33 = vector.broadcast %32 : vector<1x128xi1> to vector<56x128xi1>
    %34 = vector.broadcast %cst_8 : f32 to vector<56x128xf32>
    %35 = arith.select %33, %31, %34 : vector<56x128xi1>, vector<56x128xf32>
    %cst_9 = arith.constant 1.000000e+01 : f32
    %36 = vector.broadcast %cst_9 : f32 to vector<56x128xf32>
    %37 = arith.mulf %3, %36 : vector<56x128xf32>
    %cst_10 = arith.constant 0xFF800000 : f32
    %38 = vector.shape_cast %27 : vector<1x128xi1> to vector<1x128xi1>
    %39 = vector.broadcast %38 : vector<1x128xi1> to vector<56x128xi1>
    %40 = vector.broadcast %cst_10 : f32 to vector<56x128xf32>
    %41 = arith.select %39, %37, %40 : vector<56x128xi1>, vector<56x128xf32>
    %c127_i32 = arith.constant 127 : i32
    %42 = tpu.dynamic_rotate %35 by %c127_i32 dim 1 : vector<56x128xf32>, i32 -> vector<56x128xf32>
    %c15_i32 = arith.constant 15 : i32
    %43 = tpu.dynamic_rotate %35 by %c15_i32 dim 1 : vector<56x128xf32>, i32 -> vector<56x128xf32>
    %c15_i32_11 = arith.constant 15 : i32
    %44 = vector.broadcast %c15_i32_11 : i32 to vector<1x128xi32>
    %45 = arith.cmpi slt, %20, %44 : vector<1x128xi32>
    %46 = vector.shape_cast %45 : vector<1x128xi1> to vector<1x128xi1>
    %47 = vector.broadcast %46 : vector<1x128xi1> to vector<56x128xi1>
    %48 = arith.select %47, %42, %43 : vector<56x128xi1>, vector<56x128xf32>
    %49 = arith.maximumf %35, %48 : vector<56x128xf32>
    %c126_i32 = arith.constant 126 : i32
    %50 = tpu.dynamic_rotate %49 by %c126_i32 dim 1 : vector<56x128xf32>, i32 -> vector<56x128xf32>
    %c14_i32_12 = arith.constant 14 : i32
    %51 = tpu.dynamic_rotate %49 by %c14_i32_12 dim 1 : vector<56x128xf32>, i32 -> vector<56x128xf32>
    %c14_i32_13 = arith.constant 14 : i32
    %52 = vector.broadcast %c14_i32_13 : i32 to vector<1x128xi32>
    %53 = arith.cmpi slt, %20, %52 : vector<1x128xi32>
    %54 = vector.shape_cast %53 : vector<1x128xi1> to vector<1x128xi1>
    %55 = vector.broadcast %54 : vector<1x128xi1> to vector<56x128xi1>
    %56 = arith.select %55, %50, %51 : vector<56x128xi1>, vector<56x128xf32>
    %57 = arith.maximumf %49, %56 : vector<56x128xf32>
    %c124_i32 = arith.constant 124 : i32
    %58 = tpu.dynamic_rotate %57 by %c124_i32 dim 1 : vector<56x128xf32>, i32 -> vector<56x128xf32>
    %c12_i32 = arith.constant 12 : i32
    %59 = tpu.dynamic_rotate %57 by %c12_i32 dim 1 : vector<56x128xf32>, i32 -> vector<56x128xf32>
    %c12_i32_14 = arith.constant 12 : i32
    %60 = vector.broadcast %c12_i32_14 : i32 to vector<1x128xi32>
    %61 = arith.cmpi slt, %20, %60 : vector<1x128xi32>
    %62 = vector.shape_cast %61 : vector<1x128xi1> to vector<1x128xi1>
    %63 = vector.broadcast %62 : vector<1x128xi1> to vector<56x128xi1>
    %64 = arith.select %63, %58, %59 : vector<56x128xi1>, vector<56x128xf32>
    %65 = arith.maximumf %57, %64 : vector<56x128xf32>
    %c120_i32 = arith.constant 120 : i32
    %66 = tpu.dynamic_rotate %65 by %c120_i32 dim 1 : vector<56x128xf32>, i32 -> vector<56x128xf32>
    %c8_i32 = arith.constant 8 : i32
    %67 = tpu.dynamic_rotate %65 by %c8_i32 dim 1 : vector<56x128xf32>, i32 -> vector<56x128xf32>
    %c8_i32_15 = arith.constant 8 : i32
    %68 = vector.broadcast %c8_i32_15 : i32 to vector<1x128xi32>
    %69 = arith.cmpi slt, %20, %68 : vector<1x128xi32>
    %70 = vector.shape_cast %69 : vector<1x128xi1> to vector<1x128xi1>
    %71 = vector.broadcast %70 : vector<1x128xi1> to vector<56x128xi1>
    %72 = arith.select %71, %66, %67 : vector<56x128xi1>, vector<56x128xf32>
    %73 = arith.maximumf %65, %72 : vector<56x128xf32>
    %c127_i32_16 = arith.constant 127 : i32
    %74 = tpu.dynamic_rotate %41 by %c127_i32_16 dim 1 : vector<56x128xf32>, i32 -> vector<56x128xf32>
    %c15_i32_17 = arith.constant 15 : i32
    %75 = tpu.dynamic_rotate %41 by %c15_i32_17 dim 1 : vector<56x128xf32>, i32 -> vector<56x128xf32>
    %c15_i32_18 = arith.constant 15 : i32
    %76 = vector.broadcast %c15_i32_18 : i32 to vector<1x128xi32>
    %77 = arith.cmpi slt, %20, %76 : vector<1x128xi32>
    %78 = vector.shape_cast %77 : vector<1x128xi1> to vector<1x128xi1>
    %79 = vector.broadcast %78 : vector<1x128xi1> to vector<56x128xi1>
    %80 = arith.select %79, %74, %75 : vector<56x128xi1>, vector<56x128xf32>
    %81 = arith.maximumf %41, %80 : vector<56x128xf32>
    %c126_i32_19 = arith.constant 126 : i32
    %82 = tpu.dynamic_rotate %81 by %c126_i32_19 dim 1 : vector<56x128xf32>, i32 -> vector<56x128xf32>
    %c14_i32_20 = arith.constant 14 : i32
    %83 = tpu.dynamic_rotate %81 by %c14_i32_20 dim 1 : vector<56x128xf32>, i32 -> vector<56x128xf32>
    %c14_i32_21 = arith.constant 14 : i32
    %84 = vector.broadcast %c14_i32_21 : i32 to vector<1x128xi32>
    %85 = arith.cmpi slt, %20, %84 : vector<1x128xi32>
    %86 = vector.shape_cast %85 : vector<1x128xi1> to vector<1x128xi1>
    %87 = vector.broadcast %86 : vector<1x128xi1> to vector<56x128xi1>
    %88 = arith.select %87, %82, %83 : vector<56x128xi1>, vector<56x128xf32>
    %89 = arith.maximumf %81, %88 : vector<56x128xf32>
    %c124_i32_22 = arith.constant 124 : i32
    %90 = tpu.dynamic_rotate %89 by %c124_i32_22 dim 1 : vector<56x128xf32>, i32 -> vector<56x128xf32>
    %c12_i32_23 = arith.constant 12 : i32
    %91 = tpu.dynamic_rotate %89 by %c12_i32_23 dim 1 : vector<56x128xf32>, i32 -> vector<56x128xf32>
    %c12_i32_24 = arith.constant 12 : i32
    %92 = vector.broadcast %c12_i32_24 : i32 to vector<1x128xi32>
    %93 = arith.cmpi slt, %20, %92 : vector<1x128xi32>
    %94 = vector.shape_cast %93 : vector<1x128xi1> to vector<1x128xi1>
    %95 = vector.broadcast %94 : vector<1x128xi1> to vector<56x128xi1>
    %96 = arith.select %95, %90, %91 : vector<56x128xi1>, vector<56x128xf32>
    %97 = arith.maximumf %89, %96 : vector<56x128xf32>
    %c120_i32_25 = arith.constant 120 : i32
    %98 = tpu.dynamic_rotate %97 by %c120_i32_25 dim 1 : vector<56x128xf32>, i32 -> vector<56x128xf32>
    %c8_i32_26 = arith.constant 8 : i32
    %99 = tpu.dynamic_rotate %97 by %c8_i32_26 dim 1 : vector<56x128xf32>, i32 -> vector<56x128xf32>
    %c8_i32_27 = arith.constant 8 : i32
    %100 = vector.broadcast %c8_i32_27 : i32 to vector<1x128xi32>
    %101 = arith.cmpi slt, %20, %100 : vector<1x128xi32>
    %102 = vector.shape_cast %101 : vector<1x128xi1> to vector<1x128xi1>
    %103 = vector.broadcast %102 : vector<1x128xi1> to vector<56x128xi1>
    %104 = arith.select %103, %98, %99 : vector<56x128xi1>, vector<56x128xf32>
    %105 = arith.maximumf %97, %104 : vector<56x128xf32>
    %106 = arith.subf %35, %73 : vector<56x128xf32>
    %107 = arith.subf %41, %105 : vector<56x128xf32>
    %108 = arith.maximumf %106, %107 : vector<56x128xf32>
    %109 = math.exp %108 : vector<56x128xf32>
    %cst_28 = arith.constant 0.000000e+00 : f32
    %110 = vector.shape_cast %22 : vector<1x128xi1> to vector<1x128xi1>
    %111 = vector.broadcast %110 : vector<1x128xi1> to vector<56x128xi1>
    %112 = vector.broadcast %cst_28 : f32 to vector<56x128xf32>
    %113 = arith.select %111, %109, %112 : vector<56x128xi1>, vector<56x128xf32>
    %114 = arith.subf %109, %113 : vector<56x128xf32>
    %c127_i32_29 = arith.constant 127 : i32
    %115 = tpu.dynamic_rotate %113 by %c127_i32_29 dim 1 : vector<56x128xf32>, i32 -> vector<56x128xf32>
    %116 = arith.addf %113, %115 : vector<56x128xf32>
    %c126_i32_30 = arith.constant 126 : i32
    %117 = tpu.dynamic_rotate %116 by %c126_i32_30 dim 1 : vector<56x128xf32>, i32 -> vector<56x128xf32>
    %118 = arith.addf %116, %117 : vector<56x128xf32>
    %c124_i32_31 = arith.constant 124 : i32
    %119 = tpu.dynamic_rotate %118 by %c124_i32_31 dim 1 : vector<56x128xf32>, i32 -> vector<56x128xf32>
    %120 = arith.addf %118, %119 : vector<56x128xf32>
    %c127_i32_32 = arith.constant 127 : i32
    %121 = tpu.dynamic_rotate %114 by %c127_i32_32 dim 1 : vector<56x128xf32>, i32 -> vector<56x128xf32>
    %122 = arith.addf %114, %121 : vector<56x128xf32>
    %c126_i32_33 = arith.constant 126 : i32
    %123 = tpu.dynamic_rotate %122 by %c126_i32_33 dim 1 : vector<56x128xf32>, i32 -> vector<56x128xf32>
    %124 = arith.addf %122, %123 : vector<56x128xf32>
    %c124_i32_34 = arith.constant 124 : i32
    %125 = tpu.dynamic_rotate %124 by %c124_i32_34 dim 1 : vector<56x128xf32>, i32 -> vector<56x128xf32>
    %126 = arith.addf %124, %125 : vector<56x128xf32>
    %c120_i32_35 = arith.constant 120 : i32
    %127 = tpu.dynamic_rotate %126 by %c120_i32_35 dim 1 : vector<56x128xf32>, i32 -> vector<56x128xf32>
    %128 = arith.addf %126, %127 : vector<56x128xf32>
    %129 = arith.addf %73, %105 : vector<56x128xf32>
    %130 = arith.mulf %120, %128 : vector<56x128xf32>
    %131 = math.log %130 : vector<56x128xf32>
    %132 = arith.addf %129, %131 : vector<56x128xf32>
    %cst_36 = arith.constant 0.000000e+00 : f32
    %133 = vector.broadcast %cst_36 : f32 to vector<56x128xf32>
    %134 = arith.maximumf %132, %133 : vector<56x128xf32>
    %135 = math.absf %132 : vector<56x128xf32>
    %cst_37 = arith.constant 0.000000e+00 : f32
    %136 = vector.broadcast %cst_37 : f32 to vector<56x128xf32>
    %137 = arith.subf %136, %135 : vector<56x128xf32>
    %138 = math.exp %137 : vector<56x128xf32>
    %139 = math.log1p %138 : vector<56x128xf32>
    %140 = arith.addf %134, %139 : vector<56x128xf32>
    %c3_i32 = arith.constant 3 : i32
    %141 = arith.muli %arg0, %c3_i32 : i32
    %142 = arith.addi %141, %arg1 : i32
    %c56_i32 = arith.constant 56 : i32
    %143 = arith.muli %142, %c56_i32 : i32
    %c256_i32 = arith.constant 256 : i32
    %144 = arith.subi %c256_i32, %143 : i32
    %145 = tpu.iota {dimensions = array<i32: 0>} : vector<56x1xi32>
    %146 = vector.broadcast %144 : i32 to vector<56x1xi32>
    %147 = arith.cmpi slt, %145, %146 : vector<56x1xi32>
    %148 = vector.broadcast %29 : vector<1x128xi1> to vector<56x128xi1>
    %149 = vector.broadcast %147 : vector<56x1xi1> to vector<56x128xi1>
    %150 = arith.andi %148, %149 : vector<56x128xi1>
    %cst_38 = arith.constant 0.000000e+00 : f32
    %151 = vector.broadcast %cst_38 : f32 to vector<56x128xf32>
    %152 = arith.select %150, %140, %151 : vector<56x128xi1>, vector<56x128xf32>
    %153 = vector.shape_cast %152 : vector<56x128xf32> to vector<7x8x128xf32>
    %cst_39 = arith.constant dense<0.000000e+00> : vector<8x128xf32>
    %154 = vector.multi_reduction <add>, %153, %cst_39 [0] : vector<7x8x128xf32> to vector<8x128xf32>
    %c0_40 = arith.constant 0 : index
    %c0_41 = arith.constant 0 : index
    %c0_42 = arith.constant 0 : index
    %155 = vector.load %arg3[%c0_40, %c0_41, %c0_42] : memref<1x8x128xf32, #tpu.memory_space<vmem>>, vector<1x8x128xf32>
    %156 = vector.shape_cast %154 : vector<8x128xf32> to vector<1x8x128xf32>
    %157 = arith.addf %155, %156 : vector<1x8x128xf32>
    %c0_43 = arith.constant 0 : index
    %c0_44 = arith.constant 0 : index
    %c0_45 = arith.constant 0 : index
    %158 = vector.load %arg3[%c0_43, %c0_44, %c0_45] : memref<1x8x128xf32, #tpu.memory_space<vmem>>, vector<1x8x128xf32>
    tpu.vector_store %arg3[%c0_43, %c0_44, %c0_45], %157 {strides = array<i32>} : memref<1x8x128xf32, #tpu.memory_space<vmem>>, vector<1x8x128xf32>,
    return
  }
  func.func @transform_0(%arg0: i32, %arg1: i32) -> (i32, i32) {
    %c3_i32 = arith.constant 3 : i32
    %0 = arith.muli %arg0, %c3_i32 : i32
    %1 = arith.addi %0, %arg1 : i32
    %c4_i32 = arith.constant 4 : i32
    %2 = arith.minsi %1, %c4_i32 : i32
    %c0_i32 = arith.constant 0 : i32
    %c0_i32_0 = arith.constant 0 : i32
    return %2, %c0_i32 : i32, i32
  }
  func.func @transform_1(%arg0: i32, %arg1: i32) -> (i32, i32, i32) {
    %c0_i32 = arith.constant 0 : i32
    %c0_i32_0 = arith.constant 0 : i32
    %c0_i32_1 = arith.constant 0 : i32
    return %arg0, %c0_i32, %c0_i32_0 : i32, i32, i32
  }
}

</mosaic_0001>

<bundles_post_ra>
// kernel: tpu_custom_call.1
= control target key start
LH: loop header
LB: loop body
LE: loop exit
PB: predicated region body
PF: predicated region fallthrough
CT: control target
= control target key end

     0   :  { %6 = vsyncpa [#allocation3], 0  ;;  %s2437_s0 = inlined_call_operand.hbm [shape: f32[256,128], index: 0, kind: input, shape index: {}]   ;;  %s2438_s1 = inlined_call_operand.hbm [shape: f32[2,8,128], index: 1, kind: output, shape index: {}]  }
   0x1   :  { %8 = vsyncpa [#allocation3 + $0x1], 0 }
   0x2   :  { %9 = vsyncpa [#allocation4], 0 }
   0x3   :  { %11 = vsyncpa [#allocation4 + $0x1], 0  ;;  %s1431_s6 = smov 0   ;;  %s1433_s7 = smov 0  }
   0x4   :  { %s1435_s8 = smov 0   ;;  %s1437_s9 = smov 0  }
   0x5   :  { %s1439_s10 = smov 0   ;;  %s1441_s11 = smov 0  }
   0x6   :  { %s1443_s12 = smov 0   ;;  %s1445_s13 = smov 0  }
   0x7   :  { %s1447_s14 = smov 0   ;;  %s1449_s15 = smov 0  }
   0x8   :  { %s1451_s16 = smov 0  }
   0x9 LB: > { %s1074_s17 = sadd.s32 4294967295, %s1406_s16   ;;  %s1075_s18 = sadd.s32 4294967294, %s1406_s16   ;;  %s1406_s16 = sphi %s1451_s16, %s17_s16   ;;  %s1402_s15 = sphi %s1449_s15, %s2466_s15   ;;  %s1398_s14 = sphi %s1447_s14, %s2465_s14   ;;  %s1394_s13 = sphi %s1445_s13, %s2464_s13   ;;  %s1390_s12 = sphi %s1443_s12, %s2463_s12   ;;  %s1386_s11 = sphi %s1441_s11, %s2462_s11   ;;  %s1382_s10 = sphi %s1439_s10, %s2461_s10   ;;  %s1378_s9 = sphi %s1437_s9, %s2460_s9   ;;  %s1374_s8 = sphi %s1435_s8, %s2459_s8   ;;  %s1370_s7 = sphi %s1433_s7, %s2458_s7   ;;  %s1366_s6 = sphi %s1431_s6, %s2457_s6  }
   0xa   : > { %s26_s19 = sadd.s32 1, %s1398_s14  ;;  %s29_s20 = sadd.s32 1, %s1402_s15 }
   0xb   : > { %p27_p0 = scmp.ge.s32.totalorder %s26_s19, 3  ;;  %s33_s21 = smul.u32 3, %s1402_s15 }
   0xc   : > { %s44_s22 = sadd.s32 1, %s1386_s11  ;;  %p51_p1 = scmp.ne.s32.totalorder %s1386_s11, %s1382_s10 }
   0xd   : > { %s2468_s19 = smov (%p27_p0, %s26_s19), 0  ;;  %s2470_s20 = smov (!%p27_p0, %s29_s20), %s1402_s15 }
   0xe   : > { %s34_s23 = sadd.s32 %s1398_s14, %s33_s21  ;;  %p52_p2 = scmp.eq.s32.totalorder %s1406_s16, 0 }
   0xf   : > { %p31_p3 = scmp.ge.s32.totalorder %s2470_s20, 2  ;;  %p35_p4 = scmp.lt.s32.totalorder %s34_s23, 4 }
  0x10   : > { %p1499_p5 = por %p52_p2, %p51_p1  ;;  %p57_p6 = scmp.ne.s32.totalorder %s1382_s10, %s1378_s9 }
  0x11   : > { %s2472_s20 = smov (%p31_p3, %s2470_s20), 0  ;;  %s2474_s23 = smov (!%p35_p4, %s34_s23), 4 }
  0x12   : > { %2441 = sst [smem:[#allocation8_spill]] %s2472_s20  ;;  %s37_s25 = smul.u32 3, %s2472_s20 }
  0x13   : > { %p58_p7 = scmp.eq.s32.totalorder %s1074_s17, 0  ;;  %s67_s26 = ssub.s32 %s1402_s15, %s2472_s20 }
  0x14   : > { %s70_s27 = sadd.s32 1, %s1374_s8  ;;  %s38_s28 = sadd.s32 %s37_s25, %s2468_s19 }
  0x15   : > { %p1514_p8 = por %p58_p7, %p57_p6  ;;  %p39_p9 = scmp.lt.s32.totalorder %s38_s28, 4 }
  0x16   : > { %p68_p10 = scmp.eq.s32.totalorder %s67_s26, 0  ;;  %p80_p11 = scmp.ne.s32.totalorder %s1374_s8, %s1370_s7 }
  0x17   : > { %p81_p12 = scmp.eq.s32.totalorder %s1074_s17, 5  ;;  %s2476_s28 = smov (!%p39_p9, %s38_s28), 4 }
  0x18   : > { %s1521_s30 = scalar_select %p68_p10, %s1374_s8, %s70_s27  }
  0x19   : > { %s41_s2 = ssub.s32 %s2474_s23, %s2476_s28  ;;  %p1524_p13 = por %p81_p12, %p80_p11 }
  0x1a   : > { %p42_p0 = scmp.eq.s32.totalorder %s41_s2, 0  ;;  %p86_p1 = scmp.ne.s32.totalorder %s1370_s7, %s1366_s6 }
  0x1b   : > { %p87_p2 = scmp.eq.s32.totalorder %s1075_s18, 5  ;;  %p1077_p4 = scmp.ge.s32.totalorder %s1406_s16, 6 }
  0x1c   : > { %s1535_s4 = scalar_select %p42_p0, %s1386_s11, %s44_s22  }
  0x1d   : > { %p1537_p3 = por %p87_p2, %p86_p1  ;;  %103 = sbr.rel (%p1077_p4) target bundleno = 71 (0x47), region = 16 }
  0x1f   : > { %s2444_s5 = scalar_select %p1537_p3, 1, 0 }
  0x24   : > { %106 = sbr.rel (!%p1499_p5) target bundleno = 71 (0x47), region = 20  ;;  %s107_s9 = sand.u32 (%p1499_p5), 1, %s1386_s11  }
  0x25   : > { %s116_s17 = smul.u32 (%p1499_p5), 7, %s2474_s23  ;;  %s1549_s26 = scalar_lea.sflag (%p1499_p5), [#allocation3], %s107_s9 }
  0x26   : > { %s1091_s21 = smul.u32 (%p1499_p5), 56, %s107_s9 }
  0x27   : > { %s117_s25 = ssub.s32 (%p1499_p5), 32, %s116_s17 }
  0x28   : > { %p118_p6 = scmp.lt.s32.totalorder (%p1499_p5), %s117_s25, 7  ;;  %s111_s27 = scalar_lea.vmem (%p1499_p5), [#allocation2], %s1091_s21 }
  0x2b   : > { %s2478_s25 = smov (!%p118_p6, %s117_s25), 7 }
  0x2c   : > { %s1546_s18 = sshll.u32 %s2478_s25, 7 }
  0x2d   : > { %s122_s22 = ssub.s32 896, %s1546_s18 }
  0x2e   : > { %123 = vsyncadd %s1549_s26, %s122_s22  ;;  %p1079_p5 = scmp.ne.s32.totalorder %s1546_s18, 0  ;;  %s1090_s24 = smul.u32 896, %s2474_s23 }
  0x2f   : > { %s128_s28 = sshll.u32 %s111_s27, 4  ;;  %s1260_s23 = scalar_lea.hbm %s2437_s0, 4096  ;;  %s1559_s28 = int_to_ptr.vmem [resolvable:$true] %s128_s28 }
  0x30   : > { %s1557_s20 = scalar_lea.hbm %s2437_s0, %s1090_s24 }
  0x31   : > { %s1256_s9 = scalar_lea.hbm %s1557_s20, %s1546_s18  ;;  %p1261_p11 = scmp.lt.u32.totalorder %s1557_s20, %s2437_s0 }
  0x32   : > { %p1257_p7 = scmp.ne.s32.totalorder %s1557_s20, %s1256_s9  ;;  %p1262_p12 = scmp.lt.u32.totalorder %s1260_s23, %s1256_s9 }
  0x33   : > { %p1264_p1 = scmp.lt.u32.totalorder %s1256_s9, %s1557_s20 }
  0x34   : > { %p1258_p9 = pnand %p1257_p7, %p1079_p5  ;;  %p1263_p0 = por %p1262_p12, %p1261_p11 }
  0x36   : > { %p1259_p10 = pneg %p1258_p9  ;;  %p1265_p2 = por %p1264_p1, %p1263_p0 }
  0x38   : > { %p1266_p4 = pnand %p1265_p2, %p1259_p10 }
  0x3a   : > { %1269 = shalt.err (!%p1266_p4)
}
  0x3b   : > { %s1270_s24 = scalar_lea.vmem %s1559_s28, %s1546_s18  ;;  %s1408_s2 = smov [#allocation2]  }
  0x3c   : > { %p1271_p6 = scmp.ne.s32.totalorder %s1559_s28, %s1270_s24  ;;  %s1274_s17 = sshll.u32 %s1408_s2, 4  ;;  %s1275_s17 = int_to_ptr.vmem [resolvable:$false] %s1274_s17 }
  0x3d   : > { %s1276_s21 = scalar_lea.vmem %s1275_s17, 1792  ;;  %p1277_p3 = scmp.lt.s32.totalorder %s1559_s28, %s1275_s17 }
  0x3e   : > { %p1272_p7 = pnand %p1271_p6, %p1079_p5  ;;  %p1278_p11 = scmp.lt.s32.totalorder %s1276_s21, %s1270_s24 }
  0x40   : > { %p1273_p9 = pneg %p1272_p7  ;;  %p1279_p12 = por %p1278_p11, %p1277_p3 }
  0x42   : > { %p1280_p0 = pnand %p1279_p12, %p1273_p9 }
  0x44   : > { %1283 = shalt.err (!%p1280_p0)
}
  0x45   : > { %s1409_s9 = smov 128   ;;  %s1410_s25 = smov 8  }
  0x46   : > { %134 = dma.hbm_to_vmem [thread:$0]  (%p1079_p5), %s1557_s20, %s1546_s18, %s1559_s28, %s1549_s26, %s1409_s9, %s1409_s9, %s1410_s25  }
  0x47 PF: > { %p1083_p10 = scmp.ge.s32.totalorder %s1406_s16, 1  ;;  %p136_p1 = scmp.lt.s32.totalorder %s1406_s16, 7 }
  0x49   : > { %p137_p2 = pnand %p1083_p10, %p136_p1 }
  0x4a   : > { %s142_s23 = sand.u32 (!%p137_p2), 1, %s1382_s10  }
  0x4b   : > { %140 = sbr.rel (%p137_p2) target bundleno = 1223 (0x4c7), region = 24  ;;  %s143_s27 = scalar_lea.sflag (!%p137_p2), [#allocation3], %s142_s23 }
  0x4c   : > { %s1092_s22 = smul.u32 (!%p137_p2), 56, %s142_s23 }
  0x4e   : > { %s1589_s24 = scalar_lea.vmem (!%p137_p2), [#allocation2], %s1092_s22 }
  0x52   : > { %1357 = dma.done.wait (%p1514_p8), %s143_s27, 896  }
  0x53   : > { %1359 = vsyncadd (%p1514_p8), %s143_s27, 4294966400  ;;  %s162_s20 = sand.u32 1, %s1370_s7   ;;  %p1085_p3 = scmp.ne.s32.totalorder %s1390_s12, 0 }
  0x54   : > { %s1084_s18 = sshll.u32 %s162_s20, 3  ;;  %v1411_v0 = vmov (!%p1085_p3), 0.0  }
  0x55   : > { %s1598_s26 = scalar_lea.vmem [#allocation5], %s1084_s18  ;;  %177 = sbr.rel (%p1085_p3) target bundleno = 92 (0x5c), region = 32 }
  0x56   : > { %178 = vst [vmem:[%s1598_s26] sm:$0xff] (!%p1085_p3), %v1411_v0 }
  0x5c PF: > { %v179_v1 = vld [vmem:[%s1589_s24] sm:$0xff]  ;;  %v186_v2 = vlaneseq  ;;  %v180_v4 = vld [vmem:[%s1589_s24 + $0x8] sm:$0xff]  ;;  %s1412_s29 = smov 15   ;;  %s1413_s28 = smov 127   ;;  %v181_v15 = vld [vmem:[%s1589_s24 + $0x10] sm:$0xff] }
  0x5d   : > { %v205_v5 = vmul.f32 -10.0, %v179_v1  ;;  %v206_v7 = vmul.f32 -10.0, %v180_v4  ;;  %v222_v10 = vmul.f32 10.0, %v180_v4  ;;  %v221_v11 = vmul.f32 10.0, %v179_v1  ;;  %v182_v19 = vld [vmem:[%s1589_s24 + $0x18] sm:$0xff]  ;;  %v183_v24 = vld [vmem:[%s1589_s24 + $0x20] sm:$0xff] }
  0x5e   : > { %v187_v3 = vand.u32 127, %v186_v2  ;;  %v207_v16 = vmul.f32 -10.0, %v181_v15  ;;  %v223_v18 = vmul.f32 10.0, %v181_v15  ;;  %v208_v21 = vmul.f32 -10.0, %v182_v19  ;;  %v184_v29 = vld [vmem:[%s1589_s24 + $0x28] sm:$0xff]  ;;  %v185_v34 = vld [vmem:[%s1589_s24 + $0x30] sm:$0xff] }
  0x5f   : > { %v224_v23 = vmul.f32 10.0, %v182_v19  ;;  %v209_v26 = vmul.f32 -10.0, %v183_v24  ;;  %v225_v28 = vmul.f32 10.0, %v183_v24  ;;  %v210_v31 = vmul.f32 -10.0, %v184_v29  ;;  %s1414_s2 = smov 126   ;;  %s1415_s17 = smov 14  }
  0x60   : > { %v1605_v6 = vand.u32 15, %v187_v3  ;;  %v226_v33 = vmul.f32 10.0, %v184_v29  ;;  %v211_v36 = vmul.f32 -10.0, %v185_v34  ;;  %v227_v38 = vmul.f32 10.0, %v185_v34  ;;  %s1416_s21 = smov 124   ;;  %s1417_s9 = smov 12  }
  0x61   : > { %s1418_s25 = smov 120   ;;  %s1419_s23 = smov 8  }
  0x62   : > { %vm200_vm0 = vcmp.lt.s32.totalorder %v1605_v6, 6  ;;  %vm201_vm1 = vcmp.ge.s32.totalorder %v1605_v6, 6  ;;  %vm202_vm2 = vcmp.lt.s32.totalorder %v1605_v6, 14  ;;  %vm265_vm4 = vcmp.lt.s32.totalorder %v1605_v6, 15  ;;  %s920_s22 = smul.u32 3, %s1394_s13  ;;  %s1087_s18 = sshll.u32 %s1394_s13, 7 }
  0x63   : > { %v1610_v8 = vsel %vm200_vm0, %v205_v5, -inf  ;;  %v1620_v9 = vsel %vm200_vm0, %v206_v7, -inf  ;;  %vm1624_vm3 = vmand %vm201_vm1, %vm202_vm2  ;;  %v1651_v17 = vsel %vm200_vm0, %v207_v16, -inf  ;;  %v1668_v22 = vsel %vm200_vm0, %v208_v21, -inf  ;;  %s1420_s13 = smov [#allocation5]  }
  0x64   : > { %251 = vrot.lane.b32.xlu1 %v1610_v8, %s1412_s29  ;;  %237 = vrot.lane.b32.xlu0 %v1610_v8, %s1413_s28  ;;  %v1634_v13 = vsel %vm1624_vm3, %v222_v10, -inf  ;;  %v1638_v14 = vsel %vm1624_vm3, %v221_v11, -inf  ;;  %v1660_v20 = vsel %vm1624_vm3, %v223_v18, -inf  ;;  %v1677_v25 = vsel %vm1624_vm3, %v224_v23, -inf  ;;  %s921_s27 = sadd.s32 %s1390_s12, %s920_s22 }
  0x65   : > { %v1685_v27 = vsel %vm200_vm0, %v209_v26, -inf  ;;  %v1694_v30 = vsel %vm1624_vm3, %v225_v28, -inf  ;;  %v1702_v32 = vsel %vm200_vm0, %v210_v31, -inf  ;;  %v1711_v35 = vsel %vm1624_vm3, %v226_v33, -inf  ;;  %s922_s24 = smul.u32 56, %s921_s27 }
  0x66   : > { %v1719_v37 = vsel %vm200_vm0, %v211_v36, -inf  ;;  %v1727_v39 = vsel %vm1624_vm3, %v227_v38, -inf  ;;  %vm354_vm5 = vcmp.lt.s32.totalorder %v1605_v6, 12  ;;  %vm399_vm6 = vcmp.lt.s32.totalorder %v1605_v6, 8 }
  0x67   : > { %s923_s12 = ssub.s32 256, %s922_s24  ;;  %vm204_vm7 = vcmp.eq.s32.totalorder %v1605_v6, 0 }
  0x68   : > { %253 = vrot.lane.b32.xlu1 %v1620_v9, %s1412_s29  ;;  %239 = vrot.lane.b32.xlu0 %v1620_v9, %s1413_s28 }
  0x6c   : > { %418 = vrot.lane.b32.xlu1 %v1634_v13, %s1413_s28  ;;  %416 = vrot.lane.b32.xlu0 %v1638_v14, %s1413_s28 }
  0x70   : > { %432 = vrot.lane.b32.xlu1 %v1634_v13, %s1412_s29  ;;  %430 = vrot.lane.b32.xlu0 %v1638_v14, %s1412_s29 }
  0x74   : > { %255 = vrot.lane.b32.xlu1 %v1651_v17, %s1412_s29  ;;  %241 = vrot.lane.b32.xlu0 %v1651_v17, %s1413_s28 }
  0x78   : > { %434 = vrot.lane.b32.xlu1 %v1660_v20, %s1412_s29  ;;  %420 = vrot.lane.b32.xlu0 %v1660_v20, %s1413_s28 }
  0x7c   : > { %257 = vrot.lane.b32.xlu1 %v1668_v22, %s1412_s29  ;;  %243 = vrot.lane.b32.xlu0 %v1668_v22, %s1413_s28 }
  0x80   : > { %436 = vrot.lane.b32.xlu1 %v1677_v25, %s1412_s29  ;;  %422 = vrot.lane.b32.xlu0 %v1677_v25, %s1413_s28 }
  0x84   : > { %259 = vrot.lane.b32.xlu1 %v1685_v27, %s1412_s29  ;;  %245 = vrot.lane.b32.xlu0 %v1685_v27, %s1413_s28 }
  0x88   : > { %438 = vrot.lane.b32.xlu1 %v1694_v30, %s1412_s29  ;;  %424 = vrot.lane.b32.xlu0 %v1694_v30, %s1413_s28 }
  0x8c   : > { %261 = vrot.lane.b32.xlu1 %v1702_v32, %s1412_s29  ;;  %247 = vrot.lane.b32.xlu0 %v1702_v32, %s1413_s28 }
  0x90   : > { %440 = vrot.lane.b32.xlu1 %v1711_v35, %s1412_s29  ;;  %426 = vrot.lane.b32.xlu0 %v1711_v35, %s1413_s28 }
  0x94   : > { %263 = vrot.lane.b32.xlu1 %v1719_v37, %s1412_s29  ;;  %249 = vrot.lane.b32.xlu0 %v1719_v37, %s1413_s28 }
  0x98   : > { %442 = vrot.lane.b32.xlu1 %v1727_v39, %s1412_s29  ;;  %428 = vrot.lane.b32.xlu0 %v1727_v39, %s1413_s28  ;;  %s993_s29 = sshll.u32 %s1598_s26, 4  ;;  %s2374_s29 = int_to_ptr.vmem [resolvable:$true] %s993_s29 }
  0xd6   : > { %v252_v40 = vpop.permute.xlu1 %251  ;;  %v238_v41 = vpop.permute.xlu0 %237 }
  0xd7   : > { %v268_v42 = vsel %vm265_vm4, %v238_v41, %v252_v40 }
  0xd8   : > { %v1737_v43 = vmax.f32 %v1610_v8, %v268_v42 }
  0xda   : > { %v254_v44 = vpop.permute.xlu1 %253  ;;  %282 = vrot.lane.b32.xlu0 %v1737_v43, %s1414_s2  ;;  %v240_v45 = vpop.permute.xlu0 %239 }
  0xdb   : > { %v269_v46 = vsel %vm265_vm4, %v240_v45, %v254_v44 }
  0xdc   : > { %v1744_v47 = vmax.f32 %v1620_v9, %v269_v46 }
  0xde   : > { %v419_v48 = vpop.permute.xlu1 %418  ;;  %296 = vrot.lane.b32.xlu0 %v1737_v43, %s1415_s17  ;;  %284 = vrot.lane.b32.xlu1 %v1744_v47, %s1414_s2  ;;  %v417_v49 = vpop.permute.xlu0 %416 }
  0xe2   : > { %v433_v50 = vpop.permute.xlu1 %432  ;;  %298 = vrot.lane.b32.xlu1 %v1744_v47, %s1415_s17  ;;  %v431_v51 = vpop.permute.xlu0 %430 }
  0xe3   : > { %v445_v26 = vsel %vm265_vm4, %v419_v48, %v433_v50  ;;  %v444_v28 = vsel %vm265_vm4, %v417_v49, %v431_v51 }
  0xe4   : > { %v1802_v29 = vmax.f32 %v1634_v13, %v445_v26  ;;  %v1805_v31 = vmax.f32 %v1638_v14, %v444_v28 }
  0xe6   : > { %v256_v52 = vpop.permute.xlu1 %255  ;;  %v242_v53 = vpop.permute.xlu0 %241 }
  0xe7   : > { %v270_v54 = vsel %vm265_vm4, %v242_v53, %v256_v52 }
  0xe8   : > { %v1755_v55 = vmax.f32 %v1651_v17, %v270_v54 }
  0xea   : > { %v435_v56 = vpop.permute.xlu1 %434  ;;  %300 = vrot.lane.b32.xlu1 %v1755_v55, %s1415_s17  ;;  %286 = vrot.lane.b32.xlu0 %v1755_v55, %s1414_s2  ;;  %v421_v57 = vpop.permute.xlu0 %420 }
  0xeb   : > { %v446_v33 = vsel %vm265_vm4, %v421_v57, %v435_v56 }
  0xec   : > { %v1818_v34 = vmax.f32 %v1660_v20, %v446_v33 }
  0xee   : > { %v258_v58 = vpop.permute.xlu1 %257  ;;  %v244_v59 = vpop.permute.xlu0 %243 }
  0xef   : > { %v271_v60 = vsel %vm265_vm4, %v244_v59, %v258_v58 }
  0xf0   : > { %v1764_v61 = vmax.f32 %v1668_v22, %v271_v60 }
  0xf2   : > { %v437_v62 = vpop.permute.xlu1 %436  ;;  %302 = vrot.lane.b32.xlu1 %v1764_v61, %s1415_s17  ;;  %288 = vrot.lane.b32.xlu0 %v1764_v61, %s1414_s2  ;;  %v423_v63 = vpop.permute.xlu0 %422 }
  0xf3   : > { %v447_v36 = vsel %vm265_vm4, %v423_v63, %v437_v62 }
  0xf4   : > { %v1827_v38 = vmax.f32 %v1677_v25, %v447_v36 }
  0xf6   : > { %v260_v0 = vpop.permute.xlu1 %259  ;;  %v246_v1 = vpop.permute.xlu0 %245 }
  0xf7   : > { %v272_v3 = vsel %vm265_vm4, %v246_v1, %v260_v0 }
  0xf8   : > { %v1773_v4 = vmax.f32 %v1685_v27, %v272_v3 }
  0xfa   : > { %v439_v5 = vpop.permute.xlu1 %438  ;;  %304 = vrot.lane.b32.xlu1 %v1773_v4, %s1415_s17  ;;  %290 = vrot.lane.b32.xlu0 %v1773_v4, %s1414_s2  ;;  %v425_v7 = vpop.permute.xlu0 %424 }
  0xfb   : > { %v448_v40 = vsel %vm265_vm4, %v425_v7, %v439_v5 }
  0xfc   : > { %v1836_v41 = vmax.f32 %v1694_v30, %v448_v40 }
  0xfe   : > { %v262_v10 = vpop.permute.xlu1 %261  ;;  %v248_v11 = vpop.permute.xlu0 %247 }
  0xff   : > { %v273_v12 = vsel %vm265_vm4, %v248_v11, %v262_v10 }
 0x100   : > { %v1782_v15 = vmax.f32 %v1702_v32, %v273_v12 }
 0x102   : > { %v441_v16 = vpop.permute.xlu1 %440  ;;  %306 = vrot.lane.b32.xlu1 %v1782_v15, %s1415_s17  ;;  %292 = vrot.lane.b32.xlu0 %v1782_v15, %s1414_s2  ;;  %v427_v18 = vpop.permute.xlu0 %426 }
 0x103   : > { %v449_v45 = vsel %vm265_vm4, %v427_v18, %v441_v16 }
 0x104   : > { %v1847_v48 = vmax.f32 %v1711_v35, %v449_v45 }
 0x106   : > { %v264_v19 = vpop.permute.xlu1 %263  ;;  %v250_v21 = vpop.permute.xlu0 %249 }
 0x107   : > { %v274_v23 = vsel %vm265_vm4, %v250_v21, %v264_v19 }
 0x108   : > { %v1791_v24 = vmax.f32 %v1719_v37, %v274_v23 }
 0x10a   : > { %308 = vrot.lane.b32.xlu1 %v1791_v24, %s1415_s17  ;;  %294 = vrot.lane.b32.xlu0 %v1791_v24, %s1414_s2  ;;  %v443_v42 = vpop.permute.xlu1 %442  ;;  %v429_v44 = vpop.permute.xlu0 %428 }
 0x10b   : > { %v450_v46 = vsel %vm265_vm4, %v429_v44, %v443_v42 }
 0x10c   : > { %v1854_v49 = vmax.f32 %v1727_v39, %v450_v46 }
 0x10e   : > { %460 = vrot.lane.b32.xlu1 %v1802_v29, %s1414_s2  ;;  %458 = vrot.lane.b32.xlu0 %v1805_v31, %s1414_s2 }
 0x112   : > { %474 = vrot.lane.b32.xlu1 %v1802_v29, %s1415_s17  ;;  %472 = vrot.lane.b32.xlu0 %v1805_v31, %s1415_s17 }
 0x116   : > { %476 = vrot.lane.b32.xlu1 %v1818_v34, %s1415_s17  ;;  %462 = vrot.lane.b32.xlu0 %v1818_v34, %s1414_s2 }
 0x11a   : > { %478 = vrot.lane.b32.xlu1 %v1827_v38, %s1415_s17  ;;  %464 = vrot.lane.b32.xlu0 %v1827_v38, %s1414_s2 }
 0x11e   : > { %480 = vrot.lane.b32.xlu1 %v1836_v41, %s1415_s17  ;;  %466 = vrot.lane.b32.xlu0 %v1836_v41, %s1414_s2 }
 0x122   : > { %482 = vrot.lane.b32.xlu1 %v1847_v48, %s1415_s17  ;;  %468 = vrot.lane.b32.xlu0 %v1847_v48, %s1414_s2 }
 0x126   : > { %484 = vrot.lane.b32.xlu1 %v1854_v49, %s1415_s17  ;;  %470 = vrot.lane.b32.xlu0 %v1854_v49, %s1414_s2  ;;  %s2372_s17 = scalar_lea.hbm %s2438_s1, %s1087_s18 }
 0x14c   : > { %v283_v50 = vpop.permute.xlu0 %282 }
 0x150   : > { %v285_v51 = vpop.permute.xlu1 %284  ;;  %v297_v52 = vpop.permute.xlu0 %296 }
 0x151   : > { %v312_v53 = vsel %vm202_vm2, %v283_v50, %v297_v52 }
 0x152   : > { %v1863_v54 = vmax.f32 %v1737_v43, %v312_v53 }
 0x154   : > { %v299_v56 = vpop.permute.xlu1 %298  ;;  %326 = vrot.lane.b32.xlu0 %v1863_v54, %s1416_s21 }
 0x155   : > { %v313_v57 = vsel %vm202_vm2, %v285_v51, %v299_v56 }
 0x156   : > { %v1870_v58 = vmax.f32 %v1744_v47, %v313_v57 }
 0x158   : > { %328 = vrot.lane.b32.xlu1 %v1870_v58, %s1416_s21  ;;  %340 = vrot.lane.b32.xlu0 %v1863_v54, %s1417_s9 }
 0x15c   : > { %v301_v43 = vpop.permute.xlu1 %300  ;;  %342 = vrot.lane.b32.xlu1 %v1870_v58, %s1417_s9  ;;  %v287_v59 = vpop.permute.xlu0 %286 }
 0x15d   : > { %v314_v60 = vsel %vm202_vm2, %v287_v59, %v301_v43 }
 0x15e   : > { %v1881_v62 = vmax.f32 %v1755_v55, %v314_v60 }
 0x160   : > { %344 = vrot.lane.b32.xlu1 %v1881_v62, %s1417_s9  ;;  %330 = vrot.lane.b32.xlu0 %v1881_v62, %s1416_s21 }
 0x164   : > { %v303_v47 = vpop.permute.xlu1 %302  ;;  %v289_v63 = vpop.permute.xlu0 %288 }
 0x165   : > { %v315_v0 = vsel %vm202_vm2, %v289_v63, %v303_v47 }
 0x166   : > { %v1890_v1 = vmax.f32 %v1764_v61, %v315_v0 }
 0x168   : > { %346 = vrot.lane.b32.xlu1 %v1890_v1, %s1417_s9  ;;  %332 = vrot.lane.b32.xlu0 %v1890_v1, %s1416_s21 }
 0x16c   : > { %v305_v55 = vpop.permute.xlu1 %304  ;;  %v291_v3 = vpop.permute.xlu0 %290 }
 0x16d   : > { %v316_v5 = vsel %vm202_vm2, %v291_v3, %v305_v55 }
 0x16e   : > { %v1899_v7 = vmax.f32 %v1773_v4, %v316_v5 }
 0x170   : > { %348 = vrot.lane.b32.xlu1 %v1899_v7, %s1417_s9  ;;  %334 = vrot.lane.b32.xlu0 %v1899_v7, %s1416_s21 }
 0x174   : > { %v307_v61 = vpop.permute.xlu1 %306  ;;  %v293_v10 = vpop.permute.xlu0 %292 }
 0x175   : > { %v317_v11 = vsel %vm202_vm2, %v293_v10, %v307_v61 }
 0x176   : > { %v1908_v12 = vmax.f32 %v1782_v15, %v317_v11 }
 0x178   : > { %350 = vrot.lane.b32.xlu1 %v1908_v12, %s1417_s9  ;;  %336 = vrot.lane.b32.xlu0 %v1908_v12, %s1416_s21 }
 0x17c   : > { %v309_v4 = vpop.permute.xlu1 %308  ;;  %v295_v16 = vpop.permute.xlu0 %294 }
 0x17d   : > { %v318_v18 = vsel %vm202_vm2, %v295_v16, %v309_v4 }
 0x17e   : > { %v1917_v19 = vmax.f32 %v1791_v24, %v318_v18 }
 0x180   : > { %v461_v21 = vpop.permute.xlu1 %460  ;;  %352 = vrot.lane.b32.xlu1 %v1917_v19, %s1417_s9  ;;  %338 = vrot.lane.b32.xlu0 %v1917_v19, %s1416_s21  ;;  %v459_v15 = vpop.permute.xlu0 %458 }
 0x184   : > { %v475_v23 = vpop.permute.xlu1 %474  ;;  %v473_v26 = vpop.permute.xlu0 %472 }
 0x185   : > { %v487_v28 = vsel %vm202_vm2, %v461_v21, %v475_v23  ;;  %v486_v33 = vsel %vm202_vm2, %v459_v15, %v473_v26 }
 0x186   : > { %v1928_v36 = vmax.f32 %v1802_v29, %v487_v28  ;;  %v1931_v24 = vmax.f32 %v1805_v31, %v486_v33 }
 0x188   : > { %v477_v40 = vpop.permute.xlu1 %476  ;;  %502 = vrot.lane.b32.xlu1 %v1928_v36, %s1416_s21  ;;  %500 = vrot.lane.b32.xlu0 %v1931_v24, %s1416_s21  ;;  %v463_v42 = vpop.permute.xlu0 %462 }
 0x189   : > { %v488_v44 = vsel %vm202_vm2, %v463_v42, %v477_v40 }
 0x18a   : > { %v1944_v31 = vmax.f32 %v1818_v34, %v488_v44 }
 0x18c   : > { %v479_v45 = vpop.permute.xlu1 %478  ;;  %516 = vrot.lane.b32.xlu1 %v1928_v36, %s1417_s9  ;;  %514 = vrot.lane.b32.xlu0 %v1931_v24, %s1417_s9  ;;  %v465_v29 = vpop.permute.xlu0 %464 }
 0x18d   : > { %v489_v46 = vsel %vm202_vm2, %v465_v29, %v479_v45 }
 0x18e   : > { %v1953_v52 = vmax.f32 %v1827_v38, %v489_v46 }
 0x190   : > { %v481_v50 = vpop.permute.xlu1 %480  ;;  %518 = vrot.lane.b32.xlu1 %v1944_v31, %s1417_s9  ;;  %504 = vrot.lane.b32.xlu0 %v1944_v31, %s1416_s21  ;;  %v467_v51 = vpop.permute.xlu0 %466 }
 0x191   : > { %v490_v53 = vsel %vm202_vm2, %v467_v51, %v481_v50 }
 0x192   : > { %v1962_v57 = vmax.f32 %v1836_v41, %v490_v53 }
 0x194   : > { %v483_v56 = vpop.permute.xlu1 %482  ;;  %520 = vrot.lane.b32.xlu1 %v1953_v52, %s1417_s9  ;;  %506 = vrot.lane.b32.xlu0 %v1953_v52, %s1416_s21  ;;  %v469_v34 = vpop.permute.xlu0 %468 }
 0x195   : > { %v491_v43 = vsel %vm202_vm2, %v469_v34, %v483_v56 }
 0x196   : > { %v1971_v60 = vmax.f32 %v1847_v48, %v491_v43 }
 0x198   : > { %v485_v59 = vpop.permute.xlu1 %484  ;;  %522 = vrot.lane.b32.xlu1 %v1962_v57, %s1417_s9  ;;  %508 = vrot.lane.b32.xlu0 %v1962_v57, %s1416_s21  ;;  %v471_v38 = vpop.permute.xlu0 %470 }
 0x199   : > { %v492_v47 = vsel %vm202_vm2, %v471_v38, %v485_v59 }
 0x19a   : > { %v1980_v41 = vmax.f32 %v1854_v49, %v492_v47 }
 0x19c   : > { %524 = vrot.lane.b32.xlu1 %v1971_v60, %s1417_s9  ;;  %510 = vrot.lane.b32.xlu0 %v1971_v60, %s1416_s21 }
 0x1a0   : > { %526 = vrot.lane.b32.xlu1 %v1980_v41, %s1417_s9  ;;  %512 = vrot.lane.b32.xlu0 %v1980_v41, %s1416_s21  ;;  %s1284_s9 = scalar_lea.vmem %s2374_s29, 128 }
 0x1a1   : > { %p1285_p8 = scmp.ne.s32.totalorder %s2374_s29, %s1284_s9 }
 0x1a3   : > { %p1286_p5 = pnand %p1285_p8, %p1524_p13 }
 0x1a5   : > { %p1287_p4 = pneg %p1286_p5 }
 0x1c6   : > { %v327_v48 = vpop.permute.xlu0 %326 }
 0x1ca   : > { %v329_v63 = vpop.permute.xlu1 %328  ;;  %v341_v0 = vpop.permute.xlu0 %340 }
 0x1cb   : > { %v357_v55 = vsel %vm354_vm5, %v327_v48, %v341_v0 }
 0x1cc   : > { %v1990_v3 = vmax.f32 %v1863_v54, %v357_v55 }
 0x1ce   : > { %v343_v5 = vpop.permute.xlu1 %342  ;;  %371 = vrot.lane.b32.xlu0 %v1990_v3, %s1418_s25 }
 0x1cf   : > { %v358_v49 = vsel %vm354_vm5, %v329_v63, %v343_v5 }
 0x1d0   : > { %v1997_v61 = vmax.f32 %v1870_v58, %v358_v49 }
 0x1d2   : > { %v345_v10 = vpop.permute.xlu1 %344  ;;  %373 = vrot.lane.b32.xlu1 %v1997_v61, %s1418_s25  ;;  %385 = vrot.lane.b32.xlu0 %v1990_v3, %s1419_s23  ;;  %v331_v54 = vpop.permute.xlu0 %330 }
 0x1d3   : > { %v359_v11 = vsel %vm354_vm5, %v331_v54, %v345_v10 }
 0x1d4   : > { %v2006_v4 = vmax.f32 %v1881_v62, %v359_v11 }
 0x1d6   : > { %387 = vrot.lane.b32.xlu1 %v1997_v61, %s1419_s23  ;;  %375 = vrot.lane.b32.xlu0 %v2006_v4, %s1418_s25 }
 0x1da   : > { %v347_v58 = vpop.permute.xlu1 %346  ;;  %389 = vrot.lane.b32.xlu1 %v2006_v4, %s1419_s23  ;;  %v333_v16 = vpop.permute.xlu0 %332 }
 0x1db   : > { %v360_v18 = vsel %vm354_vm5, %v333_v16, %v347_v58 }
 0x1dc   : > { %v2017_v21 = vmax.f32 %v1890_v1, %v360_v18 }
 0x1de   : > { %391 = vrot.lane.b32.xlu1 %v2017_v21, %s1419_s23  ;;  %377 = vrot.lane.b32.xlu0 %v2017_v21, %s1418_s25 }
 0x1e2   : > { %v349_v62 = vpop.permute.xlu1 %348  ;;  %v335_v15 = vpop.permute.xlu0 %334 }
 0x1e3   : > { %v361_v23 = vsel %vm354_vm5, %v335_v15, %v349_v62 }
 0x1e4   : > { %v2026_v26 = vmax.f32 %v1899_v7, %v361_v23 }
 0x1e6   : > { %393 = vrot.lane.b32.xlu1 %v2026_v26, %s1419_s23  ;;  %379 = vrot.lane.b32.xlu0 %v2026_v26, %s1418_s25 }
 0x1ea   : > { %v351_v1 = vpop.permute.xlu1 %350  ;;  %v337_v28 = vpop.permute.xlu0 %336 }
 0x1eb   : > { %v362_v33 = vsel %vm354_vm5, %v337_v28, %v351_v1 }
 0x1ec   : > { %v2035_v40 = vmax.f32 %v1908_v12, %v362_v33 }
 0x1ee   : > { %395 = vrot.lane.b32.xlu1 %v2035_v40, %s1419_s23  ;;  %381 = vrot.lane.b32.xlu0 %v2035_v40, %s1418_s25 }
 0x1f2   : > { %v353_v7 = vpop.permute.xlu1 %352  ;;  %v339_v42 = vpop.permute.xlu0 %338 }
 0x1f3   : > { %v363_v44 = vsel %vm354_vm5, %v339_v42, %v353_v7 }
 0x1f4   : > { %v2044_v45 = vmax.f32 %v1917_v19, %v363_v44 }
 0x1f6   : > { %397 = vrot.lane.b32.xlu1 %v2044_v45, %s1419_s23  ;;  %383 = vrot.lane.b32.xlu0 %v2044_v45, %s1418_s25 }
 0x1fa   : > { %v503_v12 = vpop.permute.xlu1 %502  ;;  %v501_v29 = vpop.permute.xlu0 %500 }
 0x1fe   : > { %v517_v46 = vpop.permute.xlu1 %516  ;;  %v515_v50 = vpop.permute.xlu0 %514 }
 0x1ff   : > { %v529_v51 = vsel %vm354_vm5, %v503_v12, %v517_v46  ;;  %v528_v53 = vsel %vm354_vm5, %v501_v29, %v515_v50 }
 0x200   : > { %v2055_v56 = vmax.f32 %v1928_v36, %v529_v51  ;;  %v535_v19 = vmax.f32 %v1931_v24, %v528_v53 }
 0x202   : > { %v519_v34 = vpop.permute.xlu1 %518  ;;  %544 = vrot.lane.b32.xlu1 %v2055_v56, %s1418_s25  ;;  %542 = vrot.lane.b32.xlu0 %v535_v19, %s1418_s25  ;;  %v505_v43 = vpop.permute.xlu0 %504 }
 0x203   : > { %v530_v59 = vsel %vm354_vm5, %v505_v43, %v519_v34 }
 0x204   : > { %v2067_v47 = vmax.f32 %v1944_v31, %v530_v59 }
 0x206   : > { %v521_v38 = vpop.permute.xlu1 %520  ;;  %558 = vrot.lane.b32.xlu1 %v2055_v56, %s1419_s23  ;;  %556 = vrot.lane.b32.xlu0 %v535_v19, %s1419_s23  ;;  %v507_v36 = vpop.permute.xlu0 %506 }
 0x207   : > { %v531_v24 = vsel %vm354_vm5, %v507_v36, %v521_v38 }
 0x208   : > { %v2076_v0 = vmax.f32 %v1953_v52, %v531_v24 }
 0x20a   : > { %v523_v48 = vpop.permute.xlu1 %522  ;;  %560 = vrot.lane.b32.xlu1 %v2067_v47, %s1419_s23  ;;  %546 = vrot.lane.b32.xlu0 %v2067_v47, %s1418_s25  ;;  %v509_v63 = vpop.permute.xlu0 %508 }
 0x20b   : > { %v532_v55 = vsel %vm354_vm5, %v509_v63, %v523_v48 }
 0x20c   : > { %v2085_v49 = vmax.f32 %v1962_v57, %v532_v55 }
 0x20e   : > { %v525_v5 = vpop.permute.xlu1 %524  ;;  %562 = vrot.lane.b32.xlu1 %v2076_v0, %s1419_s23  ;;  %548 = vrot.lane.b32.xlu0 %v2076_v0, %s1418_s25  ;;  %v511_v31 = vpop.permute.xlu0 %510 }
 0x20f   : > { %v533_v10 = vsel %vm354_vm5, %v511_v31, %v525_v5 }
 0x210   : > { %v2094_v11 = vmax.f32 %v1971_v60, %v533_v10 }
 0x212   : > { %v527_v54 = vpop.permute.xlu1 %526  ;;  %564 = vrot.lane.b32.xlu1 %v2085_v49, %s1419_s23  ;;  %550 = vrot.lane.b32.xlu0 %v2085_v49, %s1418_s25  ;;  %v513_v52 = vpop.permute.xlu0 %512 }
 0x213   : > { %v534_v58 = vsel %vm354_vm5, %v513_v52, %v527_v54 }
 0x214   : > { %v2103_v57 = vmax.f32 %v1980_v41, %v534_v58 }
 0x216   : > { %566 = vrot.lane.b32.xlu1 %v2094_v11, %s1419_s23  ;;  %552 = vrot.lane.b32.xlu0 %v2094_v11, %s1418_s25 }
 0x21a   : > { %568 = vrot.lane.b32.xlu1 %v2103_v57, %s1419_s23  ;;  %554 = vrot.lane.b32.xlu0 %v2103_v57, %s1418_s25 }
 0x240   : > { %v372_v16 = vpop.permute.xlu0 %371 }
 0x244   : > { %v374_v60 = vpop.permute.xlu1 %373  ;;  %v386_v62 = vpop.permute.xlu0 %385 }
 0x245   : > { %v402_v29 = vsel %vm399_vm6, %v372_v16, %v386_v62 }
 0x246   : > { %v409_v53 = vmax.f32 %v1990_v3, %v402_v29 }
 0x248   : > { %v388_v18 = vpop.permute.xlu1 %387  ;;  %v376_v23 = vpop.permute.xlu0 %375  ;;  %v584_v55 = vsub.f32 %v1610_v8, %v409_v53 }
 0x249   : > { %v403_v46 = vsel %vm399_vm6, %v374_v60, %v388_v18 }
 0x24a   : > { %v410_v34 = vmax.f32 %v1997_v61, %v403_v46 }
 0x24c   : > { %v390_v15 = vpop.permute.xlu1 %389  ;;  %v585_v3 = vsub.f32 %v1620_v9, %v410_v34 }
 0x24d   : > { %v404_v43 = vsel %vm399_vm6, %v376_v23, %v390_v15 }
 0x24e   : > { %v411_v61 = vmax.f32 %v2006_v4, %v404_v43 }
 0x250   : > { %v392_v1 = vpop.permute.xlu1 %391  ;;  %v378_v28 = vpop.permute.xlu0 %377  ;;  %v586_v60 = vsub.f32 %v1651_v17, %v411_v61 }
 0x251   : > { %v405_v5 = vsel %vm399_vm6, %v378_v28, %v392_v1 }
 0x252   : > { %v412_v16 = vmax.f32 %v2017_v21, %v405_v5 }
 0x254   : > { %v587_v21 = vsub.f32 %v1668_v22, %v412_v16 }
 0x258   : > { %v394_v33 = vpop.permute.xlu1 %393  ;;  %v380_v7 = vpop.permute.xlu0 %379 }
 0x260   : > { %v396_v42 = vpop.permute.xlu1 %395  ;;  %v382_v44 = vpop.permute.xlu0 %381 }
 0x268   : > { %v398_v41 = vpop.permute.xlu1 %397  ;;  %v384_v12 = vpop.permute.xlu0 %383 }
 0x274   : > { %v545_v50 = vpop.permute.xlu1 %544  ;;  %v543_v51 = vpop.permute.xlu0 %542 }
 0x278   : > { %v559_v59 = vpop.permute.xlu1 %558  ;;  %v557_v38 = vpop.permute.xlu0 %556 }
 0x279   : > { %v571_v36 = vsel %vm399_vm6, %v545_v50, %v559_v59  ;;  %v570_v24 = vsel %vm399_vm6, %v543_v51, %v557_v38 }
 0x27a   : > { %v578_v48 = vmax.f32 %v2055_v56, %v571_v36  ;;  %v577_v63 = vmax.f32 %v535_v19, %v570_v24 }
 0x27c   : > { %v592_v31 = vsub.f32 %v1634_v13, %v578_v48  ;;  %v2129_v10 = vadd.f32 %v578_v48, %v410_v34  ;;  %v591_v54 = vsub.f32 %v1638_v14, %v577_v63  ;;  %v2132_v52 = vadd.f32 %v577_v63, %v409_v53  ;;  %v561_v58 = vpop.permute.xlu1 %560  ;;  %v547_v56 = vpop.permute.xlu0 %546 }
 0x27d   : > { %v572_v8 = vsel %vm399_vm6, %v547_v56, %v561_v58  ;;  %v406_v13 = vsel %vm399_vm6, %v380_v7, %v394_v33  ;;  %v407_v33 = vsel %vm399_vm6, %v382_v44, %v396_v42  ;;  %v408_v42 = vsel %vm399_vm6, %v384_v12, %v398_v41 }
 0x27e   : > { %v599_v19 = vmax.f32 %v585_v3, %v592_v31  ;;  %v598_v9 = vmax.f32 %v584_v55, %v591_v54  ;;  %v579_v4 = vmax.f32 %v2067_v47, %v572_v8  ;;  %v413_v29 = vmax.f32 %v2026_v26, %v406_v13 }
 0x27f   : > { %v414_v34 = vmax.f32 %v2035_v40, %v407_v33 }
 0x280   : > { %v607_v18 = vmul.f32 1.442695, %v599_v19  ;;  %v605_v14 = vmul.f32 1.442695, %v598_v9  ;;  %v593_v62 = vsub.f32 %v1660_v20, %v579_v4  ;;  %v2142_v15 = vadd.f32 %v579_v4, %v411_v61  ;;  %v563_v23 = vpop.permute.xlu1 %562  ;;  %v549_v1 = vpop.permute.xlu0 %548 }
 0x281   : > { %v573_v28 = vsel %vm399_vm6, %v549_v1, %v563_v23  ;;  %v588_v26 = vsub.f32 %v1685_v27, %v413_v29  ;;  %v415_v27 = vmax.f32 %v2044_v45, %v408_v42  ;;  %v589_v48 = vsub.f32 %v1702_v32, %v414_v34 }
 0x282   : > { %1200 = vpow2.f32 %v607_v18  ;;  %v600_v47 = vmax.f32 %v586_v60, %v593_v62  ;;  %v580_v17 = vmax.f32 %v2076_v0, %v573_v28 }
 0x283   : > { %1202 = vpow2.f32 %v605_v14 }
 0x284   : > { %v609_v20 = vmul.f32 1.442695, %v600_v47  ;;  %v594_v7 = vsub.f32 %v1677_v25, %v580_v17  ;;  %v2152_v46 = vadd.f32 %v580_v17, %v412_v16  ;;  %v565_v50 = vpop.permute.xlu1 %564  ;;  %v551_v51 = vpop.permute.xlu0 %550 }
 0x285   : > { %v574_v53 = vsel %vm399_vm6, %v551_v51, %v565_v50 }
 0x286   : > { %1204 = vpow2.f32 %v609_v20  ;;  %v601_v0 = vmax.f32 %v587_v21, %v594_v7  ;;  %v581_v22 = vmax.f32 %v2085_v49, %v574_v53 }
 0x288   : > { %v611_v44 = vmul.f32 1.442695, %v601_v0  ;;  %v595_v25 = vsub.f32 %v1694_v30, %v581_v22  ;;  %v2162_v43 = vadd.f32 %v581_v22, %v413_v29  ;;  %v567_v59 = vpop.permute.xlu1 %566  ;;  %v553_v38 = vpop.permute.xlu0 %552 }
 0x289   : > { %v575_v36 = vsel %vm399_vm6, %v553_v38, %v567_v59 }
 0x28a   : > { %1206 = vpow2.f32 %v611_v44  ;;  %v602_v24 = vmax.f32 %v588_v26, %v595_v25  ;;  %v582_v49 = vmax.f32 %v2094_v11, %v575_v36 }
 0x28c   : > { %v1201_v40 = vpop.eup %1200  ;;  %v613_v41 = vmul.f32 1.442695, %v602_v24  ;;  %v596_v12 = vsub.f32 %v1711_v35, %v582_v49  ;;  %v2170_v30 = vadd.f32 %v582_v49, %v414_v34  ;;  %v569_v63 = vpop.permute.xlu1 %568  ;;  %v590_v35 = vsub.f32 %v1719_v37, %v415_v27 }
 0x28d   : > { %v555_v55 = vpop.permute.xlu0 %554  ;;  %v1203_v3 = vpop.eup %1202  ;;  %v2176_v5 = vsel %vm200_vm0, %v1201_v40, 0.0 }
 0x28e   : > { %v576_v61 = vsel %vm399_vm6, %v555_v55, %v569_v63  ;;  %1208 = vpow2.f32 %v613_v41  ;;  %v603_v45 = vmax.f32 %v589_v48, %v596_v12  ;;  %v627_v32 = vsub.f32 %v1201_v40, %v2176_v5 }
 0x28f   : > { %v583_v11 = vmax.f32 %v2103_v57, %v576_v61  ;;  %v619_v31 = vsel %vm200_vm0, %v1203_v3, 0.0 }
 0x290   : > { %v1205_v54 = vpop.eup %1204  ;;  %v615_v58 = vmul.f32 1.442695, %v603_v45  ;;  %698 = vrot.lane.b32.xlu1 %v627_v32, %s1413_s28  ;;  %v626_v19 = vsub.f32 %v1203_v3, %v619_v31 }
 0x291   : > { %v597_v56 = vsub.f32 %v1727_v39, %v583_v11  ;;  %v2184_v8 = vadd.f32 %v583_v11, %v415_v27  ;;  %v621_v9 = vsel %vm200_vm0, %v1205_v54, 0.0 }
 0x292   : > { %1210 = vpow2.f32 %v615_v58  ;;  %696 = vrot.lane.b32.xlu0 %v626_v19, %s1413_s28  ;;  %v628_v37 = vsub.f32 %v1205_v54, %v621_v9 }
 0x293   : > { %v604_v57 = vmax.f32 %v590_v35, %v597_v56 }
 0x294   : > { %v1207_v4 = vpop.eup %1206 }
 0x295   : > { %v617_v60 = vmul.f32 1.442695, %v604_v57  ;;  %v622_v16 = vsel %vm200_vm0, %v1207_v4, 0.0 }
 0x296   : > { %700 = vrot.lane.b32.xlu0 %v628_v37, %s1413_s28  ;;  %v629_v39 = vsub.f32 %v1207_v4, %v622_v16 }
 0x297   : > { %1212 = vpow2.f32 %v617_v60 }
 0x298   : > { %v1209_v13 = vpop.eup %1208  ;;  %702 = vrot.lane.b32.xlu1 %v629_v39, %s1413_s28 }
 0x299   : > { %v623_v18 = vsel %vm200_vm0, %v1209_v13, 0.0 }
 0x29a   : > { %v630_v14 = vsub.f32 %v1209_v13, %v623_v18 }
 0x29c   : > { %v1211_v62 = vpop.eup %1210  ;;  %704 = vrot.lane.b32.xlu0 %v630_v14, %s1413_s28 }
 0x29d   : > { %v624_v23 = vsel %vm200_vm0, %v1211_v62, 0.0 }
 0x29e   : > { %v631_v1 = vsub.f32 %v1211_v62, %v624_v23 }
 0x2a0   : > { %706 = vrot.lane.b32.xlu1 %v631_v1, %s1413_s28 }
 0x2a1   : > { %v1213_v28 = vpop.eup %1212 }
 0x2a2   : > { %v2202_v47 = vsel %vm200_vm0, %v1213_v28, 0.0 }
 0x2a3   : > { %v632_v17 = vsub.f32 %v1213_v28, %v2202_v47 }
 0x2a4   : > { %633 = vrot.lane.b32.xlu1 %v619_v31, %s1413_s28 }
 0x2a5   : > { %708 = vrot.lane.b32.xlu0 %v632_v17, %s1413_s28 }
 0x2a8   : > { %637 = vrot.lane.b32.xlu1 %v621_v9, %s1413_s28 }
 0x2a9   : > { %635 = vrot.lane.b32.xlu0 %v2176_v5, %s1413_s28 }
 0x2ac   : > { %639 = vrot.lane.b32.xlu1 %v622_v16, %s1413_s28 }
 0x302   : > { %v699_v21 = vpop.permute.xlu1 %698 }
 0x303   : > { %v711_v29 = vadd.f32 %v699_v21, %v627_v32 }
 0x304   : > { %v697_v33 = vpop.permute.xlu0 %696 }
 0x305   : > { %v710_v20 = vadd.f32 %v697_v33, %v626_v19  ;;  %719 = vrot.lane.b32.xlu0 %v711_v29, %s1414_s2 }
 0x307   : > { %717 = vrot.lane.b32.xlu1 %v710_v20, %s1414_s2 }
 0x308   : > { %v701_v7 = vpop.permute.xlu0 %700 }
 0x309   : > { %v712_v50 = vadd.f32 %v701_v7, %v628_v37 }
 0x30a   : > { %v703_v51 = vpop.permute.xlu1 %702 }
 0x30b   : > { %641 = vrot.lane.b32.xlu1 %v623_v18, %s1413_s28  ;;  %721 = vrot.lane.b32.xlu0 %v712_v50, %s1414_s2  ;;  %v713_v53 = vadd.f32 %v703_v51, %v629_v39 }
 0x30e   : > { %v705_v0 = vpop.permute.xlu0 %704 }
 0x30f   : > { %643 = vrot.lane.b32.xlu1 %v624_v23, %s1413_s28  ;;  %723 = vrot.lane.b32.xlu0 %v713_v53, %s1414_s2  ;;  %v714_v22 = vadd.f32 %v705_v0, %v630_v14 }
 0x312   : > { %v707_v26 = vpop.permute.xlu1 %706 }
 0x313   : > { %645 = vrot.lane.b32.xlu1 %v2202_v47, %s1413_s28  ;;  %725 = vrot.lane.b32.xlu0 %v714_v22, %s1414_s2  ;;  %v715_v34 = vadd.f32 %v707_v26, %v631_v1 }
 0x316   : > { %v634_v42 = vpop.permute.xlu1 %633 }
 0x317   : > { %v709_v44 = vpop.permute.xlu0 %708  ;;  %727 = vrot.lane.b32.xlu0 %v715_v34, %s1414_s2  ;;  %v647_v25 = vadd.f32 %v634_v42, %v619_v31 }
 0x318   : > { %v716_v59 = vadd.f32 %v709_v44, %v632_v17 }
 0x319   : > { %654 = vrot.lane.b32.xlu1 %v647_v25, %s1414_s2 }
 0x31a   : > { %v638_v38 = vpop.permute.xlu1 %637 }
 0x31b   : > { %v636_v36 = vpop.permute.xlu0 %635  ;;  %729 = vrot.lane.b32.xlu0 %v716_v59, %s1414_s2  ;;  %v649_v24 = vadd.f32 %v638_v38, %v621_v9 }
 0x31c   : > { %v648_v49 = vadd.f32 %v636_v36, %v2176_v5 }
 0x31d   : > { %658 = vrot.lane.b32.xlu1 %v649_v24, %s1414_s2 }
 0x31e   : > { %v640_v27 = vpop.permute.xlu1 %639 }
 0x31f   : > { %656 = vrot.lane.b32.xlu0 %v648_v49, %s1414_s2  ;;  %v650_v40 = vadd.f32 %v640_v27, %v622_v16 }
 0x321   : > { %660 = vrot.lane.b32.xlu1 %v650_v40, %s1414_s2 }
 0x377   : > { %v720_v48 = vpop.permute.xlu0 %719 }
 0x378   : > { %v732_v41 = vadd.f32 %v720_v48, %v711_v29 }
 0x379   : > { %v718_v12 = vpop.permute.xlu1 %717 }
 0x37a   : > { %v731_v63 = vadd.f32 %v718_v12, %v710_v20  ;;  %740 = vrot.lane.b32.xlu0 %v732_v41, %s1416_s21 }
 0x37c   : > { %738 = vrot.lane.b32.xlu1 %v731_v63, %s1416_s21 }
 0x37d   : > { %v642_v55 = vpop.permute.xlu1 %641  ;;  %v722_v3 = vpop.permute.xlu0 %721 }
 0x37e   : > { %v651_v61 = vadd.f32 %v642_v55, %v623_v18  ;;  %v733_v5 = vadd.f32 %v722_v3, %v712_v50 }
 0x380   : > { %662 = vrot.lane.b32.xlu1 %v651_v61, %s1414_s2  ;;  %742 = vrot.lane.b32.xlu0 %v733_v5, %s1416_s21 }
 0x381   : > { %v644_v45 = vpop.permute.xlu1 %643  ;;  %v724_v11 = vpop.permute.xlu0 %723 }
 0x382   : > { %v652_v32 = vadd.f32 %v644_v45, %v624_v23  ;;  %v734_v35 = vadd.f32 %v724_v11, %v713_v53 }
 0x384   : > { %664 = vrot.lane.b32.xlu1 %v652_v32, %s1414_s2  ;;  %744 = vrot.lane.b32.xlu0 %v734_v35, %s1416_s21 }
 0x385   : > { %v646_v31 = vpop.permute.xlu1 %645  ;;  %v726_v54 = vpop.permute.xlu0 %725 }
 0x386   : > { %v653_v58 = vadd.f32 %v646_v31, %v2202_v47  ;;  %v735_v56 = vadd.f32 %v726_v54, %v714_v22 }
 0x388   : > { %666 = vrot.lane.b32.xlu1 %v653_v58, %s1414_s2  ;;  %746 = vrot.lane.b32.xlu0 %v735_v56, %s1416_s21 }
 0x389   : > { %v728_v19 = vpop.permute.xlu0 %727 }
 0x38a   : > { %v736_v9 = vadd.f32 %v728_v19, %v715_v34 }
 0x38b   : > { %v655_v57 = vpop.permute.xlu1 %654 }
 0x38c   : > { %748 = vrot.lane.b32.xlu0 %v736_v9, %s1416_s21  ;;  %v668_v37 = vadd.f32 %v655_v57, %v647_v25 }
 0x38d   : > { %v730_v4 = vpop.permute.xlu0 %729 }
 0x38e   : > { %v737_v60 = vadd.f32 %v730_v4, %v716_v59  ;;  %675 = vrot.lane.b32.xlu1 %v668_v37, %s1416_s21 }
 0x38f   : > { %v659_v16 = vpop.permute.xlu1 %658 }
 0x390   : > { %750 = vrot.lane.b32.xlu0 %v737_v60, %s1416_s21  ;;  %v670_v39 = vadd.f32 %v659_v16, %v649_v24 }
 0x391   : > { %v657_v13 = vpop.permute.xlu0 %656 }
 0x392   : > { %v669_v18 = vadd.f32 %v657_v13, %v648_v49  ;;  %679 = vrot.lane.b32.xlu1 %v670_v39, %s1416_s21 }
 0x393   : > { %v661_v14 = vpop.permute.xlu1 %660 }
 0x394   : > { %677 = vrot.lane.b32.xlu0 %v669_v18, %s1416_s21  ;;  %v671_v62 = vadd.f32 %v661_v14, %v650_v40 }
 0x396   : > { %681 = vrot.lane.b32.xlu1 %v671_v62, %s1416_s21 }
 0x3ec   : > { %v741_v23 = vpop.permute.xlu0 %740 }
 0x3ed   : > { %v753_v1 = vadd.f32 %v741_v23, %v732_v41 }
 0x3ee   : > { %v739_v28 = vpop.permute.xlu1 %738 }
 0x3ef   : > { %v752_v47 = vadd.f32 %v739_v28, %v731_v63  ;;  %761 = vrot.lane.b32.xlu0 %v753_v1, %s1418_s25 }
 0x3f1   : > { %759 = vrot.lane.b32.xlu1 %v752_v47, %s1418_s25 }
 0x3f2   : > { %v663_v17 = vpop.permute.xlu1 %662  ;;  %v743_v21 = vpop.permute.xlu0 %742 }
 0x3f3   : > { %v672_v29 = vadd.f32 %v663_v17, %v651_v61  ;;  %v754_v33 = vadd.f32 %v743_v21, %v733_v5 }
 0x3f5   : > { %683 = vrot.lane.b32.xlu1 %v672_v29, %s1416_s21  ;;  %763 = vrot.lane.b32.xlu0 %v754_v33, %s1418_s25 }
 0x3f6   : > { %v665_v20 = vpop.permute.xlu1 %664  ;;  %v745_v7 = vpop.permute.xlu0 %744 }
 0x3f7   : > { %v673_v50 = vadd.f32 %v665_v20, %v652_v32  ;;  %v755_v51 = vadd.f32 %v745_v7, %v734_v35 }
 0x3f9   : > { %685 = vrot.lane.b32.xlu1 %v673_v50, %s1416_s21  ;;  %765 = vrot.lane.b32.xlu0 %v755_v51, %s1418_s25 }
 0x3fa   : > { %v667_v53 = vpop.permute.xlu1 %666  ;;  %v747_v0 = vpop.permute.xlu0 %746 }
 0x3fb   : > { %v674_v22 = vadd.f32 %v667_v53, %v653_v58  ;;  %v756_v26 = vadd.f32 %v747_v0, %v735_v56 }
 0x3fd   : > { %687 = vrot.lane.b32.xlu1 %v674_v22, %s1416_s21  ;;  %767 = vrot.lane.b32.xlu0 %v756_v26, %s1418_s25  ;;  %s980_s21 = scalar_lea.sflag [#allocation4], %s162_s20 }
 0x3fe   : > { %v749_v34 = vpop.permute.xlu0 %748 }
 0x3ff   : > { %v757_v42 = vadd.f32 %v749_v34, %v736_v9 }
 0x400   : > { %v676_v59 = vpop.permute.xlu1 %675 }
 0x401   : > { %769 = vrot.lane.b32.xlu0 %v757_v42, %s1418_s25  ;;  %v689_v41 = vadd.f32 %v676_v59, %v668_v37 }
 0x402   : > { %v751_v44 = vpop.permute.xlu0 %750 }
 0x403   : > { %v758_v25 = vadd.f32 %v751_v44, %v737_v60 }
 0x404   : > { %v680_v38 = vpop.permute.xlu1 %679 }
 0x405   : > { %771 = vrot.lane.b32.xlu0 %v758_v25, %s1418_s25  ;;  %v691_v61 = vadd.f32 %v680_v38, %v670_v39  ;;  %s1288_s25 = sshll.u32 %s1420_s13, 4  ;;  %s1289_s25 = int_to_ptr.vmem [resolvable:$false] %s1288_s25 }
 0x406   : > { %v678_v36 = vpop.permute.xlu0 %677  ;;  %s1290_s23 = scalar_lea.vmem %s1289_s25, 256  ;;  %p1291_p6 = scmp.lt.s32.totalorder %s2374_s29, %s1289_s25 }
 0x407   : > { %v690_v27 = vadd.f32 %v678_v36, %v669_v18  ;;  %p1292_p7 = scmp.lt.s32.totalorder %s1290_s23, %s1284_s9 }
 0x408   : > { %v682_v24 = vpop.permute.xlu1 %681 }
 0x409   : > { %v692_v35 = vadd.f32 %v682_v24, %v671_v62  ;;  %p1293_p9 = por %p1292_p7, %p1291_p6 }
 0x40b   : > { %p1294_p11 = pnand %p1293_p9, %p1287_p4 }
 0x461   : > { %v762_v49 = vpop.permute.xlu0 %761 }
 0x462   : > { %v774_v40 = vadd.f32 %v762_v49, %v753_v1 }
 0x463   : > { %v760_v48 = vpop.permute.xlu1 %759 }
 0x464   : > { %v773_v12 = vadd.f32 %v760_v48, %v752_v47  ;;  %v788_v63 = vmul.f32 %v774_v40, %v690_v27 }
 0x466   : > { %v787_v55 = vmul.f32 %v773_v12, %v689_v41  ;;  %1214 = vlog2.f32 %v788_v63 }
 0x467   : > { %v764_v3 = vpop.permute.xlu0 %763  ;;  %v684_v45 = vpop.permute.xlu1 %683 }
 0x468   : > { %1216 = vlog2.f32 %v787_v55  ;;  %v775_v5 = vadd.f32 %v764_v3, %v754_v33  ;;  %v693_v9 = vadd.f32 %v684_v45, %v672_v29  ;;  %v2279_v45 = vshrl.u32 %v186_v2, 7 }
 0x46a   : > { %v789_v11 = vmul.f32 %v775_v5, %v691_v61 }
 0x46b   : > { %v766_v32 = vpop.permute.xlu0 %765  ;;  %v686_v58 = vpop.permute.xlu1 %685 }
 0x46c   : > { %1218 = vlog2.f32 %v789_v11  ;;  %v776_v31 = vadd.f32 %v766_v32, %v755_v51  ;;  %v694_v18 = vadd.f32 %v686_v58, %v673_v50 }
 0x46e   : > { %v790_v54 = vmul.f32 %v776_v31, %v692_v35 }
 0x46f   : > { %v768_v56 = vpop.permute.xlu0 %767  ;;  %v688_v1 = vpop.permute.xlu1 %687 }
 0x470   : > { %v1215_v19 = vpop.eup %1214  ;;  %1220 = vlog2.f32 %v790_v54  ;;  %v777_v57 = vadd.f32 %v768_v56, %v756_v26  ;;  %v695_v20 = vadd.f32 %v688_v1, %v674_v22  ;;  %v926_v56 = vadd.s32 8, %v2279_v45 }
 0x471   : > { %v797_v37 = vmul.f32 0.6931472, %v1215_v19  ;;  %v2285_v19 = vstv %s923_s12 }
 0x472   : > { %v1217_v4 = vpop.eup %1216  ;;  %v791_v60 = vmul.f32 %v777_v57, %v693_v9  ;;  %vm933_vm8 = vcmp.lt.s32.totalorder %v2279_v45, %v2285_v19  ;;  %vm934_vm9 = vcmp.lt.s32.totalorder %v926_v56, %v2285_v19 }
 0x473   : > { %v795_v16 = vmul.f32 0.6931472, %v1217_v4  ;;  %v2253_v39 = vadd.f32 %v797_v37, %v2129_v10  ;;  %v770_v13 = vpop.permute.xlu0 %769  ;;  %vm2309_vm12 = vmand %vm204_vm7, %vm934_vm9 }
 0x474   : > { %1222 = vlog2.f32 %v791_v60  ;;  %v778_v14 = vadd.f32 %v770_v13, %v757_v42  ;;  %vm2319_vm13 = vmand %vm204_vm7, %vm933_vm8 }
 0x475   : > { %v2256_v62 = vadd.f32 %v795_v16, %v2132_v52  ;;  %v823_v23 = vand.u32 2147483647, %v2253_v39 }
 0x476   : > { %v1219_v28 = vpop.eup %1218  ;;  %v792_v47 = vmul.f32 %v778_v14, %v694_v18  ;;  %v816_v14 = vmax.f32 %v2253_v39, 0.0 }
 0x477   : > { %v822_v17 = vand.u32 2147483647, %v2256_v62  ;;  %v830_v21 = vsub.f32 0.0, %v823_v23  ;;  %v799_v29 = vmul.f32 0.6931472, %v1219_v28  ;;  %v772_v33 = vpop.permute.xlu0 %771  ;;  %v927_v23 = vadd.s32 16, %v2279_v45 }
 0x478   : > { %1224 = vlog2.f32 %v792_v47  ;;  %v779_v10 = vadd.f32 %v772_v33, %v758_v25 }
 0x479   : > { %v829_v7 = vsub.f32 0.0, %v822_v17  ;;  %v838_v50 = vmul.f32 1.442695, %v830_v21  ;;  %v2261_v51 = vadd.f32 %v799_v29, %v2142_v15  ;;  %v815_v21 = vmax.f32 %v2256_v62, 0.0 }
 0x47a   : > { %v1221_v52 = vpop.eup %1220  ;;  %v793_v53 = vmul.f32 %v779_v10, %v695_v20  ;;  %vm935_vm14 = vcmp.lt.s32.totalorder %v927_v23, %v2285_v19 }
 0x47b   : > { %v836_v0 = vmul.f32 1.442695, %v829_v7  ;;  %1226 = vpow2.f32 %v838_v50  ;;  %v824_v26 = vand.u32 2147483647, %v2261_v51  ;;  %v801_v34 = vmul.f32 0.6931472, %v1221_v52  ;;  %vm958_vm0 = vmand %vm204_vm7, %vm935_vm14 }
 0x47c   : > { %1228 = vlog2.f32 %v793_v53  ;;  %v931_v7 = vadd.s32 48, %v2279_v45 }
 0x47d   : > { %1230 = vpow2.f32 %v836_v0  ;;  %v831_v42 = vsub.f32 0.0, %v824_v26  ;;  %v2265_v44 = vadd.f32 %v801_v34, %v2152_v46 }
 0x47e   : > { %v1223_v22 = vpop.eup %1222 }
 0x47f   : > { %v840_v25 = vmul.f32 1.442695, %v831_v42  ;;  %v803_v59 = vmul.f32 0.6931472, %v1223_v22  ;;  %v825_v15 = vand.u32 2147483647, %v2265_v44 }
 0x481   : > { %1232 = vpow2.f32 %v840_v25  ;;  %v2270_v38 = vadd.f32 %v803_v59, %v2162_v43  ;;  %v832_v24 = vsub.f32 0.0, %v825_v15  ;;  %v928_v15 = vadd.s32 24, %v2279_v45 }
 0x482   : > { %v1225_v36 = vpop.eup %1224 }
 0x483   : > { %v826_v49 = vand.u32 2147483647, %v2270_v38  ;;  %v805_v27 = vmul.f32 0.6931472, %v1225_v36  ;;  %v842_v40 = vmul.f32 1.442695, %v832_v24  ;;  %vm936_vm1 = vcmp.lt.s32.totalorder %v928_v15, %v2285_v19 }
 0x484   : > { %v817_v24 = vmax.f32 %v2261_v51, 0.0  ;;  %vm2345_vm3 = vmand %vm204_vm7, %vm936_vm1 }
 0x485   : > { %v1227_v48 = vpop.eup %1226  ;;  %v833_v41 = vsub.f32 0.0, %v826_v49  ;;  %v2275_v46 = vadd.f32 %v805_v27, %v2170_v30  ;;  %1234 = vpow2.f32 %v842_v40 }
 0x486   : > { %v1229_v12 = vpop.eup %1228  ;;  %v859_v63 = vadd.f32 1.0, %v1227_v48  ;;  %v862_v30 = vmul.f32 -0.5, %v1227_v48  ;;  %v865_v2 = vand.u32 2147483647, %v1227_v48 }
 0x487   : > { %v1231_v55 = vpop.eup %1230  ;;  %v844_v3 = vmul.f32 1.442695, %v833_v41  ;;  %v827_v43 = vand.u32 2147483647, %v2275_v46  ;;  %v807_v11 = vmul.f32 0.6931472, %v1229_v12 }
 0x488   : > { %v850_v61 = vadd.f32 1.0, %v1231_v55  ;;  %1236 = vlog2.f32 %v859_v63  ;;  %v853_v54 = vmul.f32 -0.5, %v1231_v55  ;;  %v863_v9 = vadd.f32 1.0, %v862_v30 }
 0x489   : > { %1238 = vpow2.f32 %v844_v3  ;;  %v834_v5 = vsub.f32 0.0, %v827_v43  ;;  %v2282_v58 = vadd.f32 %v807_v11, %v2184_v8  ;;  %v856_v4 = vand.u32 2147483647, %v1231_v55 }
 0x48a   : > { %1240 = vlog2.f32 %v850_v61  ;;  %v854_v60 = vadd.f32 1.0, %v853_v54  ;;  %v864_v47 = vmul.f32 %v1227_v48, %v863_v9  ;;  %vm866_vm10 = vcmp.lt.f32.partialorder %v865_v2, 0.0004427343 }
 0x48b   : > { %v1233_v32 = vpop.eup %1232  ;;  %v846_v35 = vmul.f32 1.442695, %v834_v5  ;;  %v828_v57 = vand.u32 2147483647, %v2282_v58  ;;  %vm2300_vm11 = vcmp.lt.f32.partialorder %v856_v4, 0.0004427343 }
 0x48c   : > { %v868_v31 = vadd.f32 1.0, %v1233_v32  ;;  %v871_v16 = vmul.f32 -0.5, %v1233_v32  ;;  %v855_v39 = vmul.f32 %v1231_v55, %v854_v60  ;;  %v874_v53 = vand.u32 2147483647, %v1233_v32 }
 0x48d   : > { %1242 = vpow2.f32 %v846_v35  ;;  %v835_v8 = vsub.f32 0.0, %v828_v57  ;;  %v929_v3 = vadd.s32 32, %v2279_v45  ;;  %v818_v54 = vmax.f32 %v2265_v44, 0.0 }
 0x48e   : > { %1244 = vlog2.f32 %v868_v31  ;;  %v872_v52 = vadd.f32 1.0, %v871_v16  ;;  %vm875_vm15 = vcmp.lt.f32.partialorder %v874_v53, 0.0004427343  ;;  %v930_v57 = vadd.s32 40, %v2279_v45 }
 0x48f   : > { %v2288_v37 = vpop.eup %1234  ;;  %v848_v20 = vmul.f32 1.442695, %v835_v8  ;;  %vm937_vm4 = vcmp.lt.s32.totalorder %v929_v3, %v2285_v19  ;;  %v819_v44 = vmax.f32 %v2270_v38, 0.0  ;;  %v820_v38 = vmax.f32 %v2275_v46, 0.0 }
 0x490   : > { %v877_v13 = vadd.f32 1.0, %v2288_v37  ;;  %v880_v0 = vmul.f32 -0.5, %v2288_v37  ;;  %v873_v27 = vmul.f32 %v1233_v32, %v872_v52  ;;  %v883_v55 = vand.u32 2147483647, %v2288_v37  ;;  %vm960_vm6 = vmand %vm204_vm7, %vm937_vm4 }
 0x491   : > { %vm938_vm8 = vcmp.lt.s32.totalorder %v930_v57, %v2285_v19  ;;  %v821_v34 = vmax.f32 %v2282_v58, 0.0 }
 0x492   : > { %v1237_v18 = vpop.eup %1236  ;;  %1246 = vlog2.f32 %v877_v13  ;;  %v881_v41 = vadd.f32 1.0, %v880_v0  ;;  %vm884_vm2 = vcmp.lt.f32.partialorder %v883_v55, 0.0004427343 }
 0x493   : > { %v2297_v1 = vpop.eup %1238  ;;  %v861_v28 = vmul.f32 0.6931472, %v1237_v18 }
 0x494   : > { %v1241_v17 = vpop.eup %1240  ;;  %v886_v33 = vadd.f32 1.0, %v2297_v1  ;;  %v889_v40 = vmul.f32 -0.5, %v2297_v1  ;;  %v882_v30 = vmul.f32 %v2288_v37, %v881_v41  ;;  %v892_v35 = vand.u32 2147483647, %v2297_v1 }
 0x495   : > { %v852_v10 = vmul.f32 0.6931472, %v1241_v17  ;;  %v867_v50 = vsel %vm866_vm10, %v864_v47, %v861_v28  ;;  %vm961_vm10 = vmand %vm204_vm7, %vm938_vm8 }
 0x496   : > { %v914_v62 = vadd.f32 %v867_v50, %v816_v14  ;;  %1248 = vlog2.f32 %v886_v33  ;;  %v890_v61 = vadd.f32 1.0, %v889_v40  ;;  %vm893_vm5 = vcmp.lt.f32.partialorder %v892_v35, 0.0004427343 }
 0x497   : > { %v1243_v26 = vpop.eup %1242  ;;  %v858_v42 = vsel %vm2300_vm11, %v855_v39, %v852_v10  ;;  %1250 = vpow2.f32 %v848_v20  ;;  %vm939_vm11 = vcmp.lt.s32.totalorder %v931_v7, %v2285_v19 }
 0x498   : > { %v1245_v22 = vpop.eup %1244  ;;  %v913_v25 = vadd.f32 %v858_v42, %v815_v21  ;;  %v964_v59 = vsel %vm2309_vm12, %v914_v62, 0.0  ;;  %v895_v36 = vadd.f32 1.0, %v1243_v26  ;;  %v898_v5 = vmul.f32 -0.5, %v1243_v26 }
 0x499   : > { %v870_v49 = vmul.f32 0.6931472, %v1245_v22  ;;  %v891_v16 = vmul.f32 %v2297_v1, %v890_v61  ;;  %v901_v8 = vand.u32 2147483647, %v1243_v26 }
 0x49a   : > { %v963_v48 = vsel %vm2319_vm13, %v913_v25, 0.0  ;;  %1252 = vlog2.f32 %v895_v36  ;;  %v899_v13 = vadd.f32 1.0, %v898_v5  ;;  %vm962_vm13 = vmand %vm204_vm7, %vm939_vm11  ;;  %v976_v25 = vld [vmem:[%s1598_s26] sm:$0xff] }
 0x49b   : > { %v970_v12 = vadd.f32 %v964_v59, %v963_v48  ;;  %v876_v63 = vsel %vm875_vm15, %v873_v27, %v870_v49  ;;  %vm902_vm9 = vcmp.lt.f32.partialorder %v901_v8, 0.0004427343 }
 0x49c   : > { %v915_v51 = vadd.f32 %v876_v63, %v817_v24  ;;  %v1247_v43 = vpop.eup %1246  ;;  %v900_v1 = vmul.f32 %v1243_v26, %v899_v13 }
 0x49d   : > { %v879_v32 = vmul.f32 0.6931472, %v1247_v43 }
 0x49e   : > { %v965_v11 = vsel %vm958_vm0, %v915_v51, 0.0 }
 0x49f   : > { %v971_v31 = vadd.f32 %v970_v12, %v965_v11  ;;  %v885_v2 = vsel %vm884_vm2, %v882_v30, %v879_v32 }
 0x4a0   : > { %v1249_v56 = vpop.eup %1248  ;;  %v916_v37 = vadd.f32 %v885_v2, %v818_v54 }
 0x4a1   : > { %v1251_v4 = vpop.eup %1250  ;;  %v888_v60 = vmul.f32 0.6931472, %v1249_v56 }
 0x4a2   : > { %v904_v18 = vadd.f32 1.0, %v1251_v4  ;;  %v966_v14 = vsel %vm2345_vm3, %v916_v37, 0.0  ;;  %v907_v20 = vmul.f32 -0.5, %v1251_v4  ;;  %v910_v53 = vand.u32 2147483647, %v1251_v4 }
 0x4a3   : > { %v894_v23 = vsel %vm893_vm5, %v891_v16, %v888_v60  ;;  %v972_v21 = vadd.f32 %v971_v31, %v966_v14 }
 0x4a4   : > { %v1253_v28 = vpop.eup %1252  ;;  %v917_v47 = vadd.f32 %v894_v23, %v819_v44  ;;  %1254 = vlog2.f32 %v904_v18  ;;  %v908_v52 = vadd.f32 1.0, %v907_v20  ;;  %vm911_vm12 = vcmp.lt.f32.partialorder %v910_v53, 0.0004427343 }
 0x4a5   : > { %v897_v17 = vmul.f32 0.6931472, %v1253_v28 }
 0x4a6   : > { %v967_v29 = vsel %vm960_vm6, %v917_v47, 0.0  ;;  %v909_v26 = vmul.f32 %v1251_v4, %v908_v52 }
 0x4a7   : > { %v903_v33 = vsel %vm902_vm9, %v900_v1, %v897_v17  ;;  %v973_v10 = vadd.f32 %v972_v21, %v967_v29 }
 0x4a8   : > { %v918_v39 = vadd.f32 %v903_v33, %v820_v38 }
 0x4aa   : > { %v968_v50 = vsel %vm961_vm10, %v918_v39, 0.0 }
 0x4ab   : > { %v974_v62 = vadd.f32 %v973_v10, %v968_v50 }
 0x4ae   : > { %v1255_v0 = vpop.eup %1254 }
 0x4af   : > { %v906_v46 = vmul.f32 0.6931472, %v1255_v0 }
 0x4b1   : > { %v912_v42 = vsel %vm911_vm12, %v909_v26, %v906_v46 }
 0x4b2   : > { %v919_v45 = vadd.f32 %v912_v42, %v821_v34 }
 0x4b4   : > { %v969_v22 = vsel %vm962_vm13, %v919_v45, 0.0 }
 0x4b5   : > { %v975_v59 = vadd.f32 %v974_v62, %v969_v22 }
 0x4b7   : > { %v977_v15 = vadd.f32 %v976_v25, %v975_v59 }
 0x4b9   : > { %978 = vst [vmem:[%s1598_s26] sm:$0xff] %v977_v15 }
 0x4ba   : > { %1297 = shalt.err (!%p1294_p11)
}
 0x4bb   : > { %s1298_s20 = scalar_lea.hbm %s2372_s17, 128  ;;  %s1302_s27 = scalar_lea.hbm %s2438_s1, 256 }
 0x4bc   : > { %p1299_p12 = scmp.ne.s32.totalorder %s2372_s17, %s1298_s20  ;;  %p1303_p1 = scmp.lt.u32.totalorder %s2372_s17, %s2438_s1 }
 0x4bd   : > { %p1304_p2 = scmp.lt.u32.totalorder %s1302_s27, %s1298_s20  ;;  %p1306_p8 = scmp.lt.u32.totalorder %s1298_s20, %s2372_s17 }
 0x4be   : > { %p1300_p0 = pnand %p1299_p12, %p1524_p13 }
 0x4bf   : > { %p1305_p3 = por %p1304_p2, %p1303_p1 }
 0x4c0   : > { %p1301_p10 = pneg %p1300_p0 }
 0x4c1   : > { %p1307_p5 = por %p1306_p8, %p1305_p3 }
 0x4c3   : > { %p1308_p4 = pnand %p1307_p5, %p1301_p10 }
 0x4c5   : > { %1311 = shalt.err (!%p1308_p4)
}
 0x4c6   : > { %1094 = dma.vmem_to_hbm [thread:$0]  (%p1524_p13), %s2374_s29, 128, %s2372_s17, %s980_s21  }
 0x4c7 PF: > { %p1100_p6 = scmp.ge.s32.totalorder %s1406_s16, 2  ;;  %s1005_s18 = sand.u32 1, %s1366_s6  }
 0x4c8   : > { %p2455_p7 = scmp.ne.s32.totalorder %s2444_s5, 0  ;;  %s1006_s28 = scalar_lea.sflag [#allocation4], %s1005_s18 }
 0x4ca   : > { %p1097_p9 = pnand %p1100_p6, %p2455_p7 }
 0x4cc   : > { %1361 = dma.done.wait (!%p1097_p9), %s1006_s28, 128  }
 0x4cd   : > { %1363 = vsyncadd (!%p1097_p9), %s1006_s28, 4294967168  ;;  %s17_s16 = sadd.s32 1, %s1406_s16   ;;  %s2456_s3 = sld [smem:[#allocation8_spill]] }
 0x4ce   : > { %p14_p11 = scmp.ge.s32.totalorder %s17_s16, 8   ;;  %s2457_s6 = smov %s1370_s7 }
 0x4cf   : > { %s2458_s7 = smov %s1374_s8  ;;  %s2459_s8 = smov %s1521_s30 }
 0x4d0   : > { %s2460_s9 = smov %s1382_s10  ;;  %s2461_s10 = smov %s1386_s11 }
 0x4d1   : > { %s2462_s11 = smov %s1535_s4  ;;  %s2463_s12 = smov %s1398_s14 }
 0x4d2   : > { %s2464_s13 = smov %s1402_s15  ;;  %s2465_s14 = smov %s2468_s19 }
 0x4d3   : > { %s2466_s15 = smov %s2456_s3  ;;  %16 = sbr.rel (!%p14_p11) target bundleno = 9 (0x9), region = 73 }
 0x4da   :  { %1011 = vsyncpa [#allocation3], 1 }
 0x4db   :  { %1013 = vsyncpa [#allocation3 + $0x1], 1 }
 0x4dc   :  { %1014 = vsyncpa [#allocation4], 1 }
 0x4dd   :  { %1016 = vsyncpa [#allocation4 + $0x1], 1 }

</bundles_post_ra>
